<compile_context>
chip_gen: v7x
topology: tpu7x:2x2x1
jax: 0.10.0
libtpu: 0.0.40
codegen_flags: <defaults>
</compile_context>

<pallas_src>
import jax
import jax.numpy as jnp
from jax import lax
from jax.experimental import pallas as pl
from jax.experimental.pallas import tpu as pltpu

BN_EPS = 1e-5  # nn.BatchNorm2d default


# ---------------------------------------------------------------------------
# Fused: conv(KHxKW, stride 1, 'valid' on a pre-padded input) + folded BN
#        [+ residual add] [+ ReLU]
# ---------------------------------------------------------------------------
def _make_conv_bn_kernel(kh_size, kw_size, h_out, w_out, apply_relu, has_residual):
    hw = h_out * w_out

    def kernel(*refs):
        if has_residual:
            x_ref, w_ref, scale_ref, bias_ref, res_ref, o_ref = refs
        else:
            x_ref, w_ref, scale_ref, bias_ref, o_ref = refs
            res_ref = None

        cin = x_ref.shape[-1]
        cout = o_ref.shape[-1]

        acc = jnp.zeros((hw, cout), jnp.float32)
        # KH*KW taps, each an (H*W, Cin) x (Cin, Cout) MXU matmul, f32 accumulate.
        for kh in range(kh_size):
            for kw in range(kw_size):
                win = x_ref[0, kh:kh + h_out, kw:kw + w_out, :]   # (h_out, w_out, cin)
                lhs = win.reshape(hw, cin)
                acc = acc + jnp.dot(lhs, w_ref[kh, kw],
                                    preferred_element_type=jnp.float32)

        # Folded-BN epilogue on the small resident (hw, cout) tile.
        out = acc * scale_ref[...] + bias_ref[...]
        if has_residual:
            out = out + res_ref[0].astype(jnp.float32)
        if apply_relu:
            out = jnp.maximum(out, 0.0)
        o_ref[0] = out.astype(o_ref.dtype)

    return kernel


def _conv_bn_act_call(x_eff, w_eff, scale, bias, h_out, w_out,
                      apply_relu, residual=None, out_dtype=jnp.float32):
    n, hp, wp, cin = x_eff.shape
    kh_size, kw_size, cin_w, cout = w_eff.shape
    assert cin_w == cin
    hw = h_out * w_out

    scale2 = scale.reshape(1, cout).astype(jnp.float32)
    bias2 = bias.reshape(1, cout).astype(jnp.float32)

    kernel = _make_conv_bn_kernel(kh_size, kw_size, h_out, w_out,
                                  apply_relu, residual is not None)

    in_specs = [
        pl.BlockSpec((1, hp, wp, cin), lambda b: (b, 0, 0, 0)),            # per-image
        pl.BlockSpec((kh_size, kw_size, cin, cout), lambda b: (0, 0, 0, 0)),  # resident
        pl.BlockSpec((1, cout), lambda b: (0, 0)),                         # bn scale
        pl.BlockSpec((1, cout), lambda b: (0, 0)),                         # bn shift
    ]
    args = [x_eff, w_eff, scale2, bias2]
    if residual is not None:
        args.append(residual.reshape(n, hw, cout).astype(jnp.float32))
        in_specs.append(pl.BlockSpec((1, hw, cout), lambda b: (b, 0, 0)))

    out = pl.pallas_call(
        kernel,
        out_shape=jax.ShapeDtypeStruct((n, hw, cout), out_dtype),
        grid=(n,),
        in_specs=in_specs,
        out_specs=pl.BlockSpec((1, hw, cout), lambda b: (b, 0, 0)),
        compiler_params=pltpu.CompilerParams(
            dimension_semantics=("parallel",)),
    )(*args)
    return out.reshape(n, h_out, w_out, cout)


# ---------------------------------------------------------------------------
# Stride handling: space-to-depth trick so the kernel stays stride-1.
# ---------------------------------------------------------------------------
def _space_to_depth2(xp):
    n, hp, wp, c = xp.shape
    assert hp % 2 == 0 and wp % 2 == 0
    x = xp.reshape(n, hp // 2, 2, wp // 2, 2, c)
    x = x.transpose(0, 1, 3, 2, 4, 5)                    # (n, hp/2, wp/2, 2, 2, c)
    return x.reshape(n, hp // 2, wp // 2, 4 * c)


def _weight_to_s2d(w):
    # (3, 3, cin, cout) HWIO -> (2, 2, 4*cin, cout) acting on the s2d input.
    _, _, cin, cout = w.shape
    w2 = jnp.zeros((2, 2, 4 * cin, cout), w.dtype)
    for kh in range(3):
        for kw in range(3):
            qh, a = divmod(kh, 2)
            qw, b = divmod(kw, 2)
            p = a * 2 + b
            w2 = w2.at[qh, qw, p * cin:(p + 1) * cin, :].set(w[kh, kw])
    return w2


def conv3x3_bn_act(x, w_hwio, scale, bias, *, stride=1, apply_relu=True, residual=None):
    """3x3 conv (pad=1, no bias) + folded BN + optional residual add + optional ReLU."""
    n, h, w, cin = x.shape
    assert w_hwio.shape[:3] == (3, 3, cin)
    xp = jnp.pad(x, ((0, 0), (1, 1), (1, 1), (0, 0)))
    if stride == 1:
        h_out, w_out = h, w
        x_eff, w_eff = xp, w_hwio
    elif stride == 2:
        assert h % 2 == 0 and w % 2 == 0
        h_out, w_out = h // 2, w // 2
        x_eff = _space_to_depth2(xp)       # (n, (h+2)//2, (w+2)//2, 4*cin)
        w_eff = _weight_to_s2d(w_hwio)     # one-time static-weight transform
    else:
        raise NotImplementedError("stride must be 1 or 2")
    return _conv_bn_act_call(x_eff, w_eff, scale, bias, h_out, w_out,
                             apply_relu, residual=residual)


# ---------------------------------------------------------------------------
# BasicBlock forward
# ---------------------------------------------------------------------------
def _fold_bn(gamma, beta, mean, var, eps=BN_EPS):
    scale = gamma / jnp.sqrt(var + eps)
    shift = beta - mean * scale
    return scale, shift


def basic_block(x, params, *, stride=1, option='A'):
    """Forward pass of BasicBlock (inference-mode BN), NHWC layout."""
    # TODO(synk): training-mode BatchNorm (batch statistics + running-stat update)
    #             is not implemented; BN is folded from running stats (eval mode).
    # prune_conv2d: with prune_flag=True the prune mask is just an elementwise weight
    # mask; it would be folded into conv*_w before the kernel (prune_flag=False here).
    n, h, w, in_planes = x.shape
    planes = params['conv1_w'].shape[-1]

    s1, b1 = _fold_bn(params['bn1_gamma'], params['bn1_beta'],
                      params['bn1_mean'], params['bn1_var'])
    s2, b2 = _fold_bn(params['bn2_gamma'], params['bn2_beta'],
                      params['bn2_mean'], params['bn2_var'])

    out = conv3x3_bn_act(x, params['conv1_w'], s1, b1,
                         stride=stride, apply_relu=True)

    if stride != 1 or in_planes != planes:
        if option == 'A':
            # F.pad(x[:, :, ::2, ::2], (0,0,0,0, planes//4, planes//4)) in NCHW terms.
            sc = x[:, ::2, ::2, :]
            pad_c = planes // 4
            sc = jnp.pad(sc, ((0, 0), (0, 0), (0, 0), (pad_c, pad_c)))
        else:
            # TODO(synk): option 'B' (1x1 conv + BN projection shortcut) not implemented.
            raise NotImplementedError("option 'B' shortcut not implemented")
    else:
        sc = x

    # conv2 + bn2 + residual add + final ReLU fused in one kernel.
    out = conv3x3_bn_act(out, params['conv2_w'], s2, b2,
                         stride=1, apply_relu=True, residual=sc)
    return out


# ---------------------------------------------------------------------------
# Pure-JAX reference (lax conv) for validation
# ---------------------------------------------------------------------------
def _conv_ref(x, w, stride):
    return lax.conv_general_dilated(
        x, w, window_strides=(stride, stride), padding=((1, 1), (1, 1)),
        dimension_numbers=('NHWC', 'HWIO', 'NHWC'),
        precision=lax.Precision.HIGHEST)


def basic_block_ref(x, params, *, stride=1, option='A'):
    n, h, w, in_planes = x.shape
    planes = params['conv1_w'].shape[-1]
    s1, b1 = _fold_bn(params['bn1_gamma'], params['bn1_beta'],
                      params['bn1_mean'], params['bn1_var'])
    s2, b2 = _fold_bn(params['bn2_gamma'], params['bn2_beta'],
                      params['bn2_mean'], params['bn2_var'])
    y = jnp.maximum(_conv_ref(x, params['conv1_w'], stride) * s1 + b1, 0.0)
    y = _conv_ref(y, params['conv2_w'], 1) * s2 + b2
    if stride != 1 or in_planes != planes:
        sc = x[:, ::2, ::2, :]
        pad_c = planes // 4
        sc = jnp.pad(sc, ((0, 0), (0, 0), (0, 0), (pad_c, pad_c)))
    else:
        sc = x
    return jnp.maximum(y + sc, 0.0)


def _make_params(key, in_planes, planes):
    ks = jax.random.split(key, 10)
    p = {
        'conv1_w': 0.1 * jax.random.normal(ks[0], (3, 3, in_planes, planes), jnp.float32),
        'conv2_w': 0.1 * jax.random.normal(ks[1], (3, 3, planes, planes), jnp.float32),
    }
    for i, name in enumerate(('bn1', 'bn2')):
        p[f'{name}_gamma'] = jax.random.uniform(ks[2 + 4 * i], (planes,), minval=0.5, maxval=1.5)
        p[f'{name}_beta'] = 0.1 * jax.random.normal(ks[3 + 4 * i], (planes,))
        p[f'{name}_mean'] = 0.1 * jax.random.normal(ks[4 + 4 * i], (planes,))
        p[f'{name}_var'] = jax.random.uniform(ks[5 + 4 * i], (planes,), minval=0.5, maxval=1.5)
    return p


if __name__ == "__main__":
    root = jax.random.PRNGKey(0)
    k_x1, k_p1, k_x2, k_p2 = jax.random.split(root, 4)

    # Case 1: identity-shortcut block (stride=1, in_planes == planes == 16).
    x1 = jax.random.normal(k_x1, (2, 16, 16, 16), jnp.float32)
    p1 = _make_params(k_p1, 16, 16)
    out1 = jax.block_until_ready(basic_block(x1, p1, stride=1))
    ref1 = basic_block_ref(x1, p1, stride=1)
    assert out1.shape == (2, 16, 16, 16)
    assert jnp.allclose(out1, ref1, atol=1e-3, rtol=1e-3), \
        float(jnp.max(jnp.abs(out1 - ref1)))

    # Case 2: downsampling block with option-'A' shortcut (stride=2, 16 -> 32).
    x2 = jax.random.normal(k_x2, (2, 16, 16, 16), jnp.float32)
    p2 = _make_params(k_p2, 16, 32)
    out2 = jax.block_until_ready(basic_block(x2, p2, stride=2, option='A'))
    ref2 = basic_block_ref(x2, p2, stride=2, option='A')
    assert out2.shape == (2, 8, 8, 32)
    assert jnp.allclose(out2, ref2, atol=1e-3, rtol=1e-3), \
        float(jnp.max(jnp.abs(out2 - ref2)))

    print("KERNEL_OK")
</pallas_src>

<mosaic_0001>
module attributes {stable_mosaic.version = 11 : i64} {
  func.func @kernel(%arg0: i32, %arg1: memref<1x18x18x16xf32, #tpu.memory_space<vmem>>, %arg2: memref<3x3x16x16xf32, #tpu.memory_space<vmem>>, %arg3: memref<1x16xf32, #tpu.memory_space<vmem>>, %arg4: memref<1x16xf32, #tpu.memory_space<vmem>>, %arg5: memref<1x256x16xf32, #tpu.memory_space<vmem>>) attributes {dimension_semantics = [#tpu.dimension_semantics<parallel>], iteration_bounds = array<i64: 2>, scalar_prefetch = 0 : i64, scratch_operands = 0 : i64, tpu.core_type = #tpu.core_type<tc>, window_params = [{transform_indices = @transform_0, window_bounds = array<i64: 1, 18, 18, 16>}, {pipeline_mode = #tpu.pipeline_mode<synchronous>, transform_indices = @transform_1, window_bounds = array<i64: 3, 3, 16, 16>}, {pipeline_mode = #tpu.pipeline_mode<synchronous>, transform_indices = @transform_2, window_bounds = array<i64: 1, 16>}, {pipeline_mode = #tpu.pipeline_mode<synchronous>, transform_indices = @transform_3, window_bounds = array<i64: 1, 16>}, {transform_indices = @transform_4, window_bounds = array<i64: 1, 256, 16>}]} {
    %cst = arith.constant 0.000000e+00 : f32
    %0 = vector.broadcast %cst : f32 to vector<256x16xf32>
    %c0 = arith.constant 0 : index
    %c0_0 = arith.constant 0 : index
    %c0_1 = arith.constant 0 : index
    %c0_2 = arith.constant 0 : index
    %1 = vector.load %arg1[%c0, %c0_0, %c0_1, %c0_2] : memref<1x18x18x16xf32, #tpu.memory_space<vmem>>, vector<1x16x16x16xf32>
    %2 = vector.shape_cast %1 : vector<1x16x16x16xf32> to vector<16x16x16xf32>
    %3 = vector.shape_cast %2 : vector<16x16x16xf32> to vector<256x16xf32>
    %c0_3 = arith.constant 0 : index
    %c0_4 = arith.constant 0 : index
    %c0_5 = arith.constant 0 : index
    %c0_6 = arith.constant 0 : index
    %4 = vector.load %arg2[%c0_3, %c0_4, %c0_5, %c0_6] : memref<3x3x16x16xf32, #tpu.memory_space<vmem>>, vector<1x1x16x16xf32>
    %5 = vector.shape_cast %4 : vector<1x1x16x16xf32> to vector<16x16xf32>
    %cst_7 = arith.constant dense<0.000000e+00> : vector<256x16xf32>
    %6 = tpu.matmul %3, %5, %cst_7 {dimension_numbers = #tpu.dot_dimension_numbers<[1], [0], [0], [1], [0, 0, 1, 1], [], []>} : vector<256x16xf32>, vector<16x16xf32>, vector<256x16xf32> -> vector<256x16xf32>
    %7 = arith.addf %0, %6 : vector<256x16xf32>
    %c0_8 = arith.constant 0 : index
    %c0_9 = arith.constant 0 : index
    %c1 = arith.constant 1 : index
    %c0_10 = arith.constant 0 : index
    %8 = vector.load %arg1[%c0_8, %c0_9, %c1, %c0_10] : memref<1x18x18x16xf32, #tpu.memory_space<vmem>>, vector<1x16x16x16xf32>
    %9 = vector.shape_cast %8 : vector<1x16x16x16xf32> to vector<16x16x16xf32>
    %10 = vector.shape_cast %9 : vector<16x16x16xf32> to vector<256x16xf32>
    %c0_11 = arith.constant 0 : index
    %c1_12 = arith.constant 1 : index
    %c0_13 = arith.constant 0 : index
    %c0_14 = arith.constant 0 : index
    %11 = vector.load %arg2[%c0_11, %c1_12, %c0_13, %c0_14] : memref<3x3x16x16xf32, #tpu.memory_space<vmem>>, vector<1x1x16x16xf32>
    %12 = vector.shape_cast %11 : vector<1x1x16x16xf32> to vector<16x16xf32>
    %cst_15 = arith.constant dense<0.000000e+00> : vector<256x16xf32>
    %13 = tpu.matmul %10, %12, %cst_15 {dimension_numbers = #tpu.dot_dimension_numbers<[1], [0], [0], [1], [0, 0, 1, 1], [], []>} : vector<256x16xf32>, vector<16x16xf32>, vector<256x16xf32> -> vector<256x16xf32>
    %14 = arith.addf %7, %13 : vector<256x16xf32>
    %c0_16 = arith.constant 0 : index
    %c0_17 = arith.constant 0 : index
    %c2 = arith.constant 2 : index
    %c0_18 = arith.constant 0 : index
    %15 = vector.load %arg1[%c0_16, %c0_17, %c2, %c0_18] : memref<1x18x18x16xf32, #tpu.memory_space<vmem>>, vector<1x16x16x16xf32>
    %16 = vector.shape_cast %15 : vector<1x16x16x16xf32> to vector<16x16x16xf32>
    %17 = vector.shape_cast %16 : vector<16x16x16xf32> to vector<256x16xf32>
    %c0_19 = arith.constant 0 : index
    %c2_20 = arith.constant 2 : index
    %c0_21 = arith.constant 0 : index
    %c0_22 = arith.constant 0 : index
    %18 = vector.load %arg2[%c0_19, %c2_20, %c0_21, %c0_22] : memref<3x3x16x16xf32, #tpu.memory_space<vmem>>, vector<1x1x16x16xf32>
    %19 = vector.shape_cast %18 : vector<1x1x16x16xf32> to vector<16x16xf32>
    %cst_23 = arith.constant dense<0.000000e+00> : vector<256x16xf32>
    %20 = tpu.matmul %17, %19, %cst_23 {dimension_numbers = #tpu.dot_dimension_numbers<[1], [0], [0], [1], [0, 0, 1, 1], [], []>} : vector<256x16xf32>, vector<16x16xf32>, vector<256x16xf32> -> vector<256x16xf32>
    %21 = arith.addf %14, %20 : vector<256x16xf32>
    %c0_24 = arith.constant 0 : index
    %c1_25 = arith.constant 1 : index
    %c0_26 = arith.constant 0 : index
    %c0_27 = arith.constant 0 : index
    %22 = vector.load %arg1[%c0_24, %c1_25, %c0_26, %c0_27] : memref<1x18x18x16xf32, #tpu.memory_space<vmem>>, vector<1x16x16x16xf32>
    %23 = vector.shape_cast %22 : vector<1x16x16x16xf32> to vector<16x16x16xf32>
    %24 = vector.shape_cast %23 : vector<16x16x16xf32> to vector<256x16xf32>
    %c1_28 = arith.constant 1 : index
    %c0_29 = arith.constant 0 : index
    %c0_30 = arith.constant 0 : index
    %c0_31 = arith.constant 0 : index
    %25 = vector.load %arg2[%c1_28, %c0_29, %c0_30, %c0_31] : memref<3x3x16x16xf32, #tpu.memory_space<vmem>>, vector<1x1x16x16xf32>
    %26 = vector.shape_cast %25 : vector<1x1x16x16xf32> to vector<16x16xf32>
    %cst_32 = arith.constant dense<0.000000e+00> : vector<256x16xf32>
    %27 = tpu.matmul %24, %26, %cst_32 {dimension_numbers = #tpu.dot_dimension_numbers<[1], [0], [0], [1], [0, 0, 1, 1], [], []>} : vector<256x16xf32>, vector<16x16xf32>, vector<256x16xf32> -> vector<256x16xf32>
    %28 = arith.addf %21, %27 : vector<256x16xf32>
    %c0_33 = arith.constant 0 : index
    %c1_34 = arith.constant 1 : index
    %c1_35 = arith.constant 1 : index
    %c0_36 = arith.constant 0 : index
    %29 = vector.load %arg1[%c0_33, %c1_34, %c1_35, %c0_36] : memref<1x18x18x16xf32, #tpu.memory_space<vmem>>, vector<1x16x16x16xf32>
    %30 = vector.shape_cast %29 : vector<1x16x16x16xf32> to vector<16x16x16xf32>
    %31 = vector.shape_cast %30 : vector<16x16x16xf32> to vector<256x16xf32>
    %c1_37 = arith.constant 1 : index
    %c1_38 = arith.constant 1 : index
    %c0_39 = arith.constant 0 : index
    %c0_40 = arith.constant 0 : index
    %32 = vector.load %arg2[%c1_37, %c1_38, %c0_39, %c0_40] : memref<3x3x16x16xf32, #tpu.memory_space<vmem>>, vector<1x1x16x16xf32>
    %33 = vector.shape_cast %32 : vector<1x1x16x16xf32> to vector<16x16xf32>
    %cst_41 = arith.constant dense<0.000000e+00> : vector<256x16xf32>
    %34 = tpu.matmul %31, %33, %cst_41 {dimension_numbers = #tpu.dot_dimension_numbers<[1], [0], [0], [1], [0, 0, 1, 1], [], []>} : vector<256x16xf32>, vector<16x16xf32>, vector<256x16xf32> -> vector<256x16xf32>
    %35 = arith.addf %28, %34 : vector<256x16xf32>
    %c0_42 = arith.constant 0 : index
    %c1_43 = arith.constant 1 : index
    %c2_44 = arith.constant 2 : index
    %c0_45 = arith.constant 0 : index
    %36 = vector.load %arg1[%c0_42, %c1_43, %c2_44, %c0_45] : memref<1x18x18x16xf32, #tpu.memory_space<vmem>>, vector<1x16x16x16xf32>
    %37 = vector.shape_cast %36 : vector<1x16x16x16xf32> to vector<16x16x16xf32>
    %38 = vector.shape_cast %37 : vector<16x16x16xf32> to vector<256x16xf32>
    %c1_46 = arith.constant 1 : index
    %c2_47 = arith.constant 2 : index
    %c0_48 = arith.constant 0 : index
    %c0_49 = arith.constant 0 : index
    %39 = vector.load %arg2[%c1_46, %c2_47, %c0_48, %c0_49] : memref<3x3x16x16xf32, #tpu.memory_space<vmem>>, vector<1x1x16x16xf32>
    %40 = vector.shape_cast %39 : vector<1x1x16x16xf32> to vector<16x16xf32>
    %cst_50 = arith.constant dense<0.000000e+00> : vector<256x16xf32>
    %41 = tpu.matmul %38, %40, %cst_50 {dimension_numbers = #tpu.dot_dimension_numbers<[1], [0], [0], [1], [0, 0, 1, 1], [], []>} : vector<256x16xf32>, vector<16x16xf32>, vector<256x16xf32> -> vector<256x16xf32>
    %42 = arith.addf %35, %41 : vector<256x16xf32>
    %c0_51 = arith.constant 0 : index
    %c2_52 = arith.constant 2 : index
    %c0_53 = arith.constant 0 : index
    %c0_54 = arith.constant 0 : index
    %43 = vector.load %arg1[%c0_51, %c2_52, %c0_53, %c0_54] : memref<1x18x18x16xf32, #tpu.memory_space<vmem>>, vector<1x16x16x16xf32>
    %44 = vector.shape_cast %43 : vector<1x16x16x16xf32> to vector<16x16x16xf32>
    %45 = vector.shape_cast %44 : vector<16x16x16xf32> to vector<256x16xf32>
    %c2_55 = arith.constant 2 : index
    %c0_56 = arith.constant 0 : index
    %c0_57 = arith.constant 0 : index
    %c0_58 = arith.constant 0 : index
    %46 = vector.load %arg2[%c2_55, %c0_56, %c0_57, %c0_58] : memref<3x3x16x16xf32, #tpu.memory_space<vmem>>, vector<1x1x16x16xf32>
    %47 = vector.shape_cast %46 : vector<1x1x16x16xf32> to vector<16x16xf32>
    %cst_59 = arith.constant dense<0.000000e+00> : vector<256x16xf32>
    %48 = tpu.matmul %45, %47, %cst_59 {dimension_numbers = #tpu.dot_dimension_numbers<[1], [0], [0], [1], [0, 0, 1, 1], [], []>} : vector<256x16xf32>, vector<16x16xf32>, vector<256x16xf32> -> vector<256x16xf32>
    %49 = arith.addf %42, %48 : vector<256x16xf32>
    %c0_60 = arith.constant 0 : index
    %c2_61 = arith.constant 2 : index
    %c1_62 = arith.constant 1 : index
    %c0_63 = arith.constant 0 : index
    %50 = vector.load %arg1[%c0_60, %c2_61, %c1_62, %c0_63] : memref<1x18x18x16xf32, #tpu.memory_space<vmem>>, vector<1x16x16x16xf32>
    %51 = vector.shape_cast %50 : vector<1x16x16x16xf32> to vector<16x16x16xf32>
    %52 = vector.shape_cast %51 : vector<16x16x16xf32> to vector<256x16xf32>
    %c2_64 = arith.constant 2 : index
    %c1_65 = arith.constant 1 : index
    %c0_66 = arith.constant 0 : index
    %c0_67 = arith.constant 0 : index
    %53 = vector.load %arg2[%c2_64, %c1_65, %c0_66, %c0_67] : memref<3x3x16x16xf32, #tpu.memory_space<vmem>>, vector<1x1x16x16xf32>
    %54 = vector.shape_cast %53 : vector<1x1x16x16xf32> to vector<16x16xf32>
    %cst_68 = arith.constant dense<0.000000e+00> : vector<256x16xf32>
    %55 = tpu.matmul %52, %54, %cst_68 {dimension_numbers = #tpu.dot_dimension_numbers<[1], [0], [0], [1], [0, 0, 1, 1], [], []>} : vector<256x16xf32>, vector<16x16xf32>, vector<256x16xf32> -> vector<256x16xf32>
    %56 = arith.addf %49, %55 : vector<256x16xf32>
    %c0_69 = arith.constant 0 : index
    %c2_70 = arith.constant 2 : index
    %c2_71 = arith.constant 2 : index
    %c0_72 = arith.constant 0 : index
    %57 = vector.load %arg1[%c0_69, %c2_70, %c2_71, %c0_72] : memref<1x18x18x16xf32, #tpu.memory_space<vmem>>, vector<1x16x16x16xf32>
    %58 = vector.shape_cast %57 : vector<1x16x16x16xf32> to vector<16x16x16xf32>
    %59 = vector.shape_cast %58 : vector<16x16x16xf32> to vector<256x16xf32>
    %c2_73 = arith.constant 2 : index
    %c2_74 = arith.constant 2 : index
    %c0_75 = arith.constant 0 : index
    %c0_76 = arith.constant 0 : index
    %60 = vector.load %arg2[%c2_73, %c2_74, %c0_75, %c0_76] : memref<3x3x16x16xf32, #tpu.memory_space<vmem>>, vector<1x1x16x16xf32>
    %61 = vector.shape_cast %60 : vector<1x1x16x16xf32> to vector<16x16xf32>
    %cst_77 = arith.constant dense<0.000000e+00> : vector<256x16xf32>
    %62 = tpu.matmul %59, %61, %cst_77 {dimension_numbers = #tpu.dot_dimension_numbers<[1], [0], [0], [1], [0, 0, 1, 1], [], []>} : vector<256x16xf32>, vector<16x16xf32>, vector<256x16xf32> -> vector<256x16xf32>
    %63 = arith.addf %56, %62 : vector<256x16xf32>
    %c0_78 = arith.constant 0 : index
    %c0_79 = arith.constant 0 : index
    %64 = vector.load %arg3[%c0_78, %c0_79] : memref<1x16xf32, #tpu.memory_space<vmem>>, vector<1x16xf32>
    %65 = vector.broadcast %64 : vector<1x16xf32> to vector<256x16xf32>
    %66 = arith.mulf %63, %65 : vector<256x16xf32>
    %c0_80 = arith.constant 0 : index
    %c0_81 = arith.constant 0 : index
    %67 = vector.load %arg4[%c0_80, %c0_81] : memref<1x16xf32, #tpu.memory_space<vmem>>, vector<1x16xf32>
    %68 = vector.broadcast %67 : vector<1x16xf32> to vector<256x16xf32>
    %69 = arith.addf %66, %68 : vector<256x16xf32>
    %cst_82 = arith.constant 0.000000e+00 : f32
    %70 = vector.broadcast %cst_82 : f32 to vector<256x16xf32>
    %71 = arith.maximumf %69, %70 : vector<256x16xf32>
    %c0_83 = arith.constant 0 : index
    %c0_84 = arith.constant 0 : index
    %c0_85 = arith.constant 0 : index
    %72 = vector.load %arg5[%c0_83, %c0_84, %c0_85] : memref<1x256x16xf32, #tpu.memory_space<vmem>>, vector<1x256x16xf32>
    %73 = vector.shape_cast %72 : vector<1x256x16xf32> to vector<256x16xf32>
    %74 = vector.shape_cast %71 : vector<256x16xf32> to vector<1x256x16xf32>
    tpu.vector_store %arg5[%c0_83, %c0_84, %c0_85], %74 {strides = array<i32>} : memref<1x256x16xf32, #tpu.memory_space<vmem>>, vector<1x256x16xf32>,
    return
  }
  func.func @transform_0(%arg0: i32) -> (i32, i32, i32, i32) {
    %c0_i32 = arith.constant 0 : i32
    %c0_i32_0 = arith.constant 0 : i32
    %c0_i32_1 = arith.constant 0 : i32
    %c0_i32_2 = arith.constant 0 : i32
    return %arg0, %c0_i32, %c0_i32_0, %c0_i32_1 : i32, i32, i32, i32
  }
  func.func @transform_1(%arg0: i32) -> (i32, i32, i32, i32) {
    %c0_i32 = arith.constant 0 : i32
    %c0_i32_0 = arith.constant 0 : i32
    %c0_i32_1 = arith.constant 0 : i32
    %c0_i32_2 = arith.constant 0 : i32
    %c0_i32_3 = arith.constant 0 : i32
    return %c0_i32, %c0_i32_0, %c0_i32_1, %c0_i32_2 : i32, i32, i32, i32
  }
  func.func @transform_2(%arg0: i32) -> (i32, i32) {
    %c0_i32 = arith.constant 0 : i32
    %c0_i32_0 = arith.constant 0 : i32
    %c0_i32_1 = arith.constant 0 : i32
    return %c0_i32, %c0_i32_0 : i32, i32
  }
  func.func @transform_3(%arg0: i32) -> (i32, i32) {
    %c0_i32 = arith.constant 0 : i32
    %c0_i32_0 = arith.constant 0 : i32
    %c0_i32_1 = arith.constant 0 : i32
    return %c0_i32, %c0_i32_0 : i32, i32
  }
  func.func @transform_4(%arg0: i32) -> (i32, i32, i32) {
    %c0_i32 = arith.constant 0 : i32
    %c0_i32_0 = arith.constant 0 : i32
    %c0_i32_1 = arith.constant 0 : i32
    return %arg0, %c0_i32, %c0_i32_0 : i32, i32, i32
  }
}

</mosaic_0001>

<bundles_post_ra>
// kernel: tpu_custom_call.1
= control target key start
LH: loop header
LB: loop body
LE: loop exit
PB: predicated region body
PF: predicated region fallthrough
CT: control target
= control target key end

     0   :  { %s5444_s15 = smov 0   ;;  %s6557_s0 = inlined_call_operand.vmem [shape: f32[2,18,18,16], index: 0, kind: input, shape index: {}]   ;;  %s6558_s1 = inlined_call_operand.vmem [shape: f32[3,3,16,16], index: 1, kind: input, shape index: {}]   ;;  %s6559_s2 = inlined_call_operand.vmem [shape: f32[1,16], index: 2, kind: input, shape index: {}]   ;;  %s6560_s3 = inlined_call_operand.vmem [shape: f32[1,16], index: 3, kind: input, shape index: {}]   ;;  %s6561_s4 = inlined_call_operand.vmem [shape: f32[2,256,16], index: 4, kind: output, shape index: {}]  }
   0x1 LB: > { %s3825_s16 = sadd.s32 4294967295, %s5417_s15   ;;  %p3829_p0 = scmp.ge.s32.totalorder %s5417_s15, 1  ;;  %s5417_s15 = sphi %s5444_s15, %s14_s15  }
   0x2   : > { %p162_p1 = scmp.lt.s32.totalorder %s5417_s15, 3 }
   0x4   : > { %p163_p2 = pnand %p3829_p0, %p162_p1 }
   0x6   : > { %166 = sbr.rel (%p163_p2) target bundleno = 527 (0x20f), region = 36 }
   0xd   : > { %v3833_v0 = vld [vmem:[%s6558_s1 + $0x10] sm:$0xff]  ;;  %v3834_v1 = vld [vmem:[%s6558_s1 + $0x18] sm:$0xff]  ;;  %v4031_v2 = vld [vmem:[%s6558_s1 + $0x40] sm:$0xff]  ;;  %p188_p3 = scmp.lt.s32.totalorder %s3825_s16, 1  ;;  %vm267_vm0 = vcmask 130048  }
   0xe   : > { %v5108_v3 = vpack.c.bf16 %v3834_v1, %v3833_v0  ;;  %v4032_v4 = vld [vmem:[%s6558_s1 + $0x48] sm:$0xff]  ;;  %v230_v5 = vld [vmem:[%s6558_s1] sm:$0xff]  ;;  %v4097_v9 = vld [vmem:[%s6558_s1 + $0x50] sm:$0xff] }
   0xf   : > { %v231_v6 = vld [vmem:[%s6558_s1 + $0x8] sm:$0xff]  ;;  %v5470_v7 = vpack.c.bf16 %v4032_v4, %v4031_v2  ;;  %s6674_s16 = smov (!%p188_p3, %s3825_s16), 1  ;;  %v4098_v10 = vld [vmem:[%s6558_s1 + $0x58] sm:$0xff]  ;;  %v4163_v12 = vld [vmem:[%s6558_s1 + $0x60] sm:$0xff] }
  0x10   : > { %v5112_v8 = vpack.c.bf16 %v231_v6, %v230_v5  ;;  %5109 = vmatprep.subr.bf16.mxu1 %v5108_v3  ;;  %v5128_v11 = vpack.c.bf16 %v4098_v10, %v4097_v9  ;;  %s5402_s7 = smul.u32 432, %s6674_s16  ;;  %v4164_v13 = vld [vmem:[%s6558_s1 + $0x68] sm:$0xff]  ;;  %v3899_v14 = vld [vmem:[%s6558_s1 + $0x20] sm:$0xff]  ;;  %v4229_v37 = vld [vmem:[%s6558_s1 + $0x70] sm:$0xff]  ;;  %s4333_s11 = sshll.u32 %s6674_s16, 8 }
  0x11   : > { %5125 = vmatprep.subr.bf16.mxu0 %v5470_v7  ;;  %5111 = vmatpush3.bf16.msra.mxu1 %v5108_v3  ;;  %v3900_v15 = vld [vmem:[%s6558_s1 + $0x28] sm:$0xff]  ;;  %v5132_v21 = vpack.c.bf16 %v4164_v13, %v4163_v12  ;;  %v4230_v38 = vld [vmem:[%s6558_s1 + $0x78] sm:$0xff]  ;;  %s6421_s14 = scalar_lea.vmem %s6561_s4, %s4333_s11 }
  0x12   : > { %5127 = vmatpush3.bf16.msra.mxu0 %v5470_v7  ;;  %5113 = vmatprep.subr.bf16.mxu1 %v5112_v8  ;;  %s5498_s20 = scalar_lea.vmem %s6557_s0, %s5402_s7  ;;  %v5509_v22 = vpack.c.bf16 %v3900_v15, %v3899_v14  ;;  %v5626_v41 = vpack.c.bf16 %v4230_v38, %v4229_v37  ;;  %v3966_v9 = vld [vmem:[%s6558_s1 + $0x38] sm:$0xff] }
  0x13   : > { %5129 = vmatprep.subr.bf16.mxu0 %v5128_v11  ;;  %v232_v16 = vld [vmem:[%s5498_s20 + $0x1] sm:$0xff]  ;;  %v3999_v17 = vld [vmem:[%s5498_s20 + $0x19] sm:$0xff]  ;;  %v233_v18 = vld [vmem:[%s5498_s20 + $0x9] sm:$0xff] }
  0x14   : > { %4644 = vmatprep.mubr.msk.f32.mxu1 %vm267_vm0, %v232_v16  ;;  %4852 = vmatprep.mubr.msk.f32.mxu0 %vm267_vm0, %v3999_v17  ;;  %v4000_v19 = vld [vmem:[%s5498_s20 + $0x21] sm:$0xff]  ;;  %v5507_v20 = vld [vmem:[%s5498_s20 + $0x31] sm:$0xff]  ;;  %v5514_v23 = vld [vmem:[%s5498_s20 + $0x39] sm:$0xff] }
  0x15   : > { %4645 = vmatmul.mubr.msk.f32.vlgmr.msra.gmra.mrb[0].mxu1 %vm267_vm0, %v233_v18  ;;  %4853 = vmatmul.mubr.msk.f32.vlgmr.msra.gmra.mrb[0].mxu0 %vm267_vm0, %v4000_v19  ;;  %v5520_v24 = vld [vmem:[%s5498_s20 + $0x49] sm:$0xff]  ;;  %v5531_v25 = vld [vmem:[%s5498_s20 + $0x51] sm:$0xff]  ;;  %v5534_v26 = vld [vmem:[%s5498_s20 + $0x61] sm:$0xff] }
  0x16   : > { %5115 = vmatpush3.bf16.msra.mxu1 %v5112_v8  ;;  %5131 = vmatpush3.bf16.msra.mxu0 %v5128_v11  ;;  %v5545_v27 = vld [vmem:[%s5498_s20 + $0x69] sm:$0xff]  ;;  %v5548_v28 = vld [vmem:[%s5498_s20 + $0x79] sm:$0xff]  ;;  %v5559_v29 = vld [vmem:[%s5498_s20 + $0x81] sm:$0xff] }
  0x17   : > { %4647 = vmatprep.mubr.msk.f32.mxu1 %vm267_vm0, %v3999_v17  ;;  %4855 = vmatprep.mubr.msk.f32.mxu0 %vm267_vm0, %v5507_v20  ;;  %v5562_v30 = vld [vmem:[%s5498_s20 + $0x91] sm:$0xff]  ;;  %v5573_v31 = vld [vmem:[%s5498_s20 + $0x99] sm:$0xff]  ;;  %v5576_v32 = vld [vmem:[%s5498_s20 + $0xa9] sm:$0xff] }
  0x18   : > { %5133 = vmatprep.subr.bf16.mxu0 %v5132_v21  ;;  %5117 = vmatprep.subr.bf16.mxu1 %v5509_v22  ;;  %v5587_v33 = vld [vmem:[%s5498_s20 + $0xb1] sm:$0xff]  ;;  %v5590_v34 = vld [vmem:[%s5498_s20 + $0xc1] sm:$0xff]  ;;  %v5601_v35 = vld [vmem:[%s5498_s20 + $0xc9] sm:$0xff] }
  0x19   : > { %4648 = vmatmul.mubr.msk.f32.gmra.mrb[2].mxu1 %vm267_vm0, %v4000_v19  ;;  %4856 = vmatmul.mubr.msk.f32.gmra.mrb[2].mxu0 %vm267_vm0, %v5514_v23  ;;  %v5604_v36 = vld [vmem:[%s5498_s20 + $0x1a] sm:$0xff]  ;;  %v5621_v39 = vld [vmem:[%s5498_s20 + $0x22] sm:$0xff]  ;;  %v5629_v42 = vld [vmem:[%s5498_s20 + $0x32] sm:$0xff] }
  0x1a   : > { %4650 = vmatprep.mubr.msk.f32.mxu1 %vm267_vm0, %v5507_v20  ;;  %4858 = vmatprep.mubr.msk.f32.mxu0 %vm267_vm0, %v5520_v24  ;;  %v5624_v40 = vld [vmem:[%s5498_s20 + $0xd9] sm:$0xff]  ;;  %v5638_v43 = vld [vmem:[%s5498_s20 + $0xe1] sm:$0xff]  ;;  %v5646_v45 = vld [vmem:[%s5498_s20 + $0xf1] sm:$0xff] }
  0x1b   : > { %6609 = vst [vmem:[#allocation2_spill] sm:$0xff] %v5624_v40  ;;  %6610 = vst [vmem:[#allocation3_spill] sm:$0xff] %v5638_v43  ;;  %v5641_v44 = vld [vmem:[%s5498_s20 + $0x3a] sm:$0xff]  ;;  %v5649_v46 = vld [vmem:[%s5498_s20 + $0x4a] sm:$0xff] }
  0x1c   : > { %6611 = vst [vmem:[#allocation4_spill] sm:$0xff] %v5646_v45  ;;  %v5661_v47 = vld [vmem:[%s5498_s20 + $0xf9] sm:$0xff]  ;;  %v5667_v49 = vld [vmem:[%s5498_s20 + $0x109] sm:$0xff]  ;;  %v5681_v51 = vld [vmem:[%s5498_s20 + $0x111] sm:$0xff] }
  0x1d   : > { %4651 = vmatmul.mubr.msk.f32.gmra.mrb[4].mxu1 %vm267_vm0, %v5514_v23  ;;  %4859 = vmatmul.mubr.msk.f32.gmra.mrb[4].mxu0 %vm267_vm0, %v5531_v25  ;;  %6612 = vst [vmem:[#allocation5_spill] sm:$0xff] %v5661_v47  ;;  %v5664_v48 = vld [vmem:[%s5498_s20 + $0x52] sm:$0xff]  ;;  %6613 = vst [vmem:[#allocation6_spill] sm:$0xff] %v5667_v49  ;;  %v5670_v50 = vld [vmem:[%s5498_s20 + $0x62] sm:$0xff] }
  0x1e   : > { %4653 = vmatprep.mubr.msk.f32.mxu1 %vm267_vm0, %v5520_v24  ;;  %4861 = vmatprep.mubr.msk.f32.mxu0 %vm267_vm0, %v5534_v26  ;;  %6614 = vst [vmem:[#allocation7_spill] sm:$0xff] %v5681_v51  ;;  %v5684_v52 = vld [vmem:[%s5498_s20 + $0x6a] sm:$0xff]  ;;  %v5687_v53 = vld [vmem:[%s5498_s20 + $0x121] sm:$0xff]  ;;  %v5707_v57 = vld [vmem:[%s5498_s20 + $0x139] sm:$0xff] }
  0x1f   : > { %6615 = vst [vmem:[#allocation8_spill] sm:$0xff] %v5687_v53  ;;  %v5690_v54 = vld [vmem:[%s5498_s20 + $0x7a] sm:$0xff]  ;;  %v5701_v55 = vld [vmem:[%s5498_s20 + $0x129] sm:$0xff]  ;;  %6617 = vst [vmem:[#allocation10_spill] sm:$0xff] %v5707_v57 }
  0x20   : > { %6616 = vst [vmem:[#allocation9_spill] sm:$0xff] %v5701_v55  ;;  %v5704_v56 = vld [vmem:[%s5498_s20 + $0x82] sm:$0xff]  ;;  %v5710_v58 = vld [vmem:[%s5498_s20 + $0x92] sm:$0xff]  ;;  %v5724_v60 = vld [vmem:[%s5498_s20 + $0x9a] sm:$0xff] }
  0x21   : > { %4654 = vmatmul.mubr.msk.f32.gmra.mrb[6].mxu1 %vm267_vm0, %v5531_v25  ;;  %4862 = vmatmul.mubr.msk.f32.gmra.mrb[6].mxu0 %vm267_vm0, %v5545_v27  ;;  %v5721_v59 = vld [vmem:[%s5498_s20 + $0x141] sm:$0xff]  ;;  %v5727_v61 = vld [vmem:[%s5498_s20 + $0x151] sm:$0xff]  ;;  %v5741_v63 = vld [vmem:[%s5498_s20 + $0x159] sm:$0xff] }
  0x22   : > { %4656 = vmatprep.mubr.msk.f32.mxu1 %vm267_vm0, %v5534_v26  ;;  %4864 = vmatprep.mubr.msk.f32.mxu0 %vm267_vm0, %v5548_v28  ;;  %6618 = vst [vmem:[#allocation11_spill] sm:$0xff] %v5721_v59  ;;  %6619 = vst [vmem:[#allocation12_spill] sm:$0xff] %v5727_v61  ;;  %v5730_v62 = vld [vmem:[%s5498_s20 + $0xaa] sm:$0xff]  ;;  %v5744_v0 = vld [vmem:[%s5498_s20 + $0xb2] sm:$0xff] }
  0x23   : > { %6620 = vst [vmem:[#allocation13_spill] sm:$0xff] %v5741_v63  ;;  %v5747_v1 = vld [vmem:[%s5498_s20 + $0x169] sm:$0xff]  ;;  %v5761_v3 = vld [vmem:[%s5498_s20 + $0x171] sm:$0xff]  ;;  %v198_v5 = vld [vmem:[%s5498_s20] sm:$0xff] }
  0x24   : > { %6621 = vst [vmem:[#allocation14_spill] sm:$0xff] %v5747_v1  ;;  %v5750_v2 = vld [vmem:[%s5498_s20 + $0xc2] sm:$0xff]  ;;  %6622 = vst [vmem:[#allocation15_spill] sm:$0xff] %v5761_v3  ;;  %v5764_v4 = vld [vmem:[%s5498_s20 + $0xca] sm:$0xff] }
  0x25   : > { %4657 = vmatmul.mubr.msk.f32.gmra.mrb[8].mxu1 %vm267_vm0, %v5545_v27  ;;  %4865 = vmatmul.mubr.msk.f32.gmra.mrb[8].mxu0 %vm267_vm0, %v5559_v29  ;;  %v5768_v6 = vld [vmem:[%s5498_s20 + $0xda] sm:$0xff]  ;;  %v3965_v8 = vld [vmem:[%s6558_s1 + $0x30] sm:$0xff]  ;;  %v199_v10 = vld [vmem:[%s5498_s20 + $0x8] sm:$0xff] }
  0x26   : > { %4659 = vmatprep.mubr.msk.f32.mxu1 %vm267_vm0, %v5548_v28  ;;  %4867 = vmatprep.mubr.msk.f32.mxu0 %vm267_vm0, %v5562_v30  ;;  %v5785_v11 = vld [vmem:[%s5498_s20 + $0xe2] sm:$0xff]  ;;  %v5788_v12 = vld [vmem:[%s5498_s20 + $0x18] sm:$0xff]  ;;  %v5790_v13 = vpack.c.bf16 %v3966_v9, %v3965_v8  ;;  %v5810_v17 = vld [vmem:[%s5498_s20 + $0x30] sm:$0xff] }
  0x27   : > { %6623 = vst [vmem:[#allocation16_spill] sm:$0xff] %v5788_v12  ;;  %v5793_v14 = vld [vmem:[%s5498_s20 + $0xf2] sm:$0xff]  ;;  %v5802_v15 = vld [vmem:[%s5498_s20 + $0x20] sm:$0xff]  ;;  %v5813_v18 = vld [vmem:[%s5498_s20 + $0x10a] sm:$0xff] }
  0x28   : > { %6624 = vst [vmem:[#allocation17_spill] sm:$0xff] %v5802_v15  ;;  %v5805_v16 = vld [vmem:[%s5498_s20 + $0xfa] sm:$0xff]  ;;  %v5834_v37 = vld [vmem:[%s5498_s20 + $0x122] sm:$0xff]  ;;  %v5845_v38 = vld [vmem:[%s5498_s20 + $0x50] sm:$0xff] }
  0x29   : > { %4660 = vmatmul.mubr.msk.f32.gmra.mrb[10].mxu1 %vm267_vm0, %v5559_v29  ;;  %4868 = vmatmul.mubr.msk.f32.gmra.mrb[10].mxu0 %vm267_vm0, %v5573_v31  ;;  %v5825_v19 = vld [vmem:[%s5498_s20 + $0x38] sm:$0xff]  ;;  %6626 = vst [vmem:[#allocation19_spill] sm:$0xff] %v5845_v38  ;;  %v5851_v8 = vld [vmem:[%s5498_s20 + $0x60] sm:$0xff] }
  0x2a   : > { %4662 = vmatprep.mubr.msk.f32.mxu1 %vm267_vm0, %v5562_v30  ;;  %4870 = vmatprep.mubr.msk.f32.mxu0 %vm267_vm0, %v5576_v32  ;;  %6627 = vst [vmem:[#allocation20_spill] sm:$0xff] %v5851_v8  ;;  %v5854_v9 = vld [vmem:[%s5498_s20 + $0x13a] sm:$0xff] }
  0x2d   : > { %4663 = vmatmul.mubr.msk.f32.gmra.mrb[12].mxu1 %vm267_vm0, %v5573_v31  ;;  %4871 = vmatmul.mubr.msk.f32.gmra.mrb[12].mxu0 %vm267_vm0, %v5587_v33 }
  0x2e   : > { %4665 = vmatprep.mubr.msk.f32.mxu1 %vm267_vm0, %v5576_v32  ;;  %4873 = vmatprep.mubr.msk.f32.mxu0 %vm267_vm0, %v5590_v34 }
  0x31   : > { %4666 = vmatmul.mubr.msk.f32.gmra.mrb[14].mxu1 %vm267_vm0, %v5587_v33  ;;  %4874 = vmatmul.mubr.msk.f32.gmra.mrb[14].mxu0 %vm267_vm0, %v5601_v35 }
  0x32   : > { %4668 = vmatprep.mubr.msk.f32.mxu1 %vm267_vm0, %v5590_v34  ;;  %4904 = vmatprep.mubr.msk.f32.mxu0 %vm267_vm0, %v5604_v36 }
  0x35   : > { %4669 = vmatmul.mubr.msk.f32.gmra.mrb[16].mxu1 %vm267_vm0, %v5601_v35  ;;  %4905 = vmatmul.mubr.msk.f32.vlgmr.msra.gmra.mrb[0].mxu0 %vm267_vm0, %v5621_v39 }
  0x36   : > { %5135 = vmatpush3.bf16.msra.mxu0 %v5132_v21  ;;  %4671 = vmatprep.mubr.msk.f32.mxu1 %vm267_vm0, %v5624_v40  ;;  %v5828_v21 = vld [vmem:[%s5498_s20 + $0x112] sm:$0xff] }
  0x37   : > { %4907 = vmatprep.mubr.msk.f32.mxu0 %vm267_vm0, %v5629_v42  ;;  %5137 = vmatprep.subr.bf16.mxu0 %v5626_v41  ;;  %v5951_v40 = vld [vmem:[%s5498_s20 + $0xd8] sm:$0xff] }
  0x39   : > { %4672 = vmatmul.mubr.msk.f32.gmra.mrb[18].mxu1 %vm267_vm0, %v5638_v43  ;;  %4908 = vmatmul.mubr.msk.f32.gmra.mrb[2].mxu0 %vm267_vm0, %v5641_v44  ;;  %v4295_v43 = vld [vmem:[%s6558_s1 + $0x80] sm:$0xff] }
  0x3a   : > { %4674 = vmatprep.mubr.msk.f32.mxu1 %vm267_vm0, %v5646_v45  ;;  %4910 = vmatprep.mubr.msk.f32.mxu0 %vm267_vm0, %v5649_v46  ;;  %v5928_v45 = vld [vmem:[%s5498_s20 + $0x18a] sm:$0xff] }
  0x3b   : > { %6638 = vst [vmem:[#allocation31_spill] sm:$0xff] %v5928_v45 }
  0x3d   : > { %4675 = vmatmul.mubr.msk.f32.gmra.mrb[20].mxu1 %vm267_vm0, %v5661_v47  ;;  %4911 = vmatmul.mubr.msk.f32.gmra.mrb[4].mxu0 %vm267_vm0, %v5664_v48  ;;  %v5914_v47 = vld [vmem:[%s5498_s20 + $0x182] sm:$0xff] }
  0x3e   : > { %4677 = vmatprep.mubr.msk.f32.mxu1 %vm267_vm0, %v5667_v49  ;;  %4913 = vmatprep.mubr.msk.f32.mxu0 %vm267_vm0, %v5670_v50  ;;  %v5911_v49 = vld [vmem:[%s5498_s20 + $0xa8] sm:$0xff]  ;;  %6636 = vst [vmem:[#allocation29_spill] sm:$0xff] %v5914_v47 }
  0x3f   : > { %6635 = vst [vmem:[#allocation28_spill] sm:$0xff] %v5911_v49 }
  0x41   : > { %4678 = vmatmul.mubr.msk.f32.gmra.mrb[22].mxu1 %vm267_vm0, %v5681_v51  ;;  %4914 = vmatmul.mubr.msk.f32.gmra.mrb[6].mxu0 %vm267_vm0, %v5684_v52  ;;  %v5908_v51 = vld [vmem:[%s5498_s20 + $0x172] sm:$0xff] }
  0x42   : > { %4680 = vmatprep.mubr.msk.f32.mxu1 %vm267_vm0, %v5687_v53  ;;  %4916 = vmatprep.mubr.msk.f32.mxu0 %vm267_vm0, %v5690_v54  ;;  %v5905_v53 = vld [vmem:[%s5498_s20 + $0x98] sm:$0xff]  ;;  %6634 = vst [vmem:[#allocation27_spill] sm:$0xff] %v5908_v51 }
  0x43   : > { %6633 = vst [vmem:[#allocation26_spill] sm:$0xff] %v5905_v53 }
  0x45   : > { %4681 = vmatmul.mubr.msk.f32.gmra.mrb[24].mxu1 %vm267_vm0, %v5701_v55  ;;  %4917 = vmatmul.mubr.msk.f32.gmra.mrb[8].mxu0 %vm267_vm0, %v5704_v56  ;;  %v5894_v55 = vld [vmem:[%s5498_s20 + $0x16a] sm:$0xff] }
  0x46   : > { %4683 = vmatprep.mubr.msk.f32.mxu1 %vm267_vm0, %v5707_v57  ;;  %4919 = vmatprep.mubr.msk.f32.mxu0 %vm267_vm0, %v5710_v58  ;;  %v5891_v57 = vld [vmem:[%s5498_s20 + $0x90] sm:$0xff]  ;;  %6632 = vst [vmem:[#allocation25_spill] sm:$0xff] %v5894_v55 }
  0x47   : > { %6631 = vst [vmem:[#allocation24_spill] sm:$0xff] %v5891_v57 }
  0x49   : > { %4684 = vmatmul.mubr.msk.f32.gmra.mrb[26].mxu1 %vm267_vm0, %v5721_v59  ;;  %4920 = vmatmul.mubr.msk.f32.gmra.mrb[10].mxu0 %vm267_vm0, %v5724_v60  ;;  %v5888_v59 = vld [vmem:[%s5498_s20 + $0x15a] sm:$0xff] }
  0x4a   : > { %4686 = vmatprep.mubr.msk.f32.mxu1 %vm267_vm0, %v5727_v61  ;;  %4922 = vmatprep.mubr.msk.f32.mxu0 %vm267_vm0, %v5730_v62  ;;  %v5885_v61 = vld [vmem:[%s5498_s20 + $0x80] sm:$0xff] }
  0x4b   : > { %6630 = vst [vmem:[#allocation23_spill] sm:$0xff] %v5885_v61 }
  0x4d   : > { %4687 = vmatmul.mubr.msk.f32.gmra.mrb[28].mxu1 %vm267_vm0, %v5741_v63  ;;  %4923 = vmatmul.mubr.msk.f32.gmra.mrb[12].mxu0 %vm267_vm0, %v5744_v0  ;;  %v5874_v63 = vld [vmem:[%s5498_s20 + $0x152] sm:$0xff] }
  0x4e   : > { %4689 = vmatprep.mubr.msk.f32.mxu1 %vm267_vm0, %v5747_v1  ;;  %4925 = vmatprep.mubr.msk.f32.mxu0 %vm267_vm0, %v5750_v2  ;;  %v5871_v1 = vld [vmem:[%s5498_s20 + $0x78] sm:$0xff] }
  0x4f   : > { %6629 = vst [vmem:[#allocation22_spill] sm:$0xff] %v5871_v1 }
  0x51   : > { %4690 = vmatmul.mubr.msk.f32.gmra.mrb[30].mxu1 %vm267_vm0, %v5761_v3  ;;  %4926 = vmatmul.mubr.msk.f32.gmra.mrb[14].mxu0 %vm267_vm0, %v5764_v4  ;;  %v5868_v3 = vld [vmem:[%s5498_s20 + $0x142] sm:$0xff] }
  0x52   : > { %4696 = vmatprep.mubr.msk.f32.mxu1 %vm267_vm0, %v198_v5  ;;  %4928 = vmatprep.mubr.msk.f32.mxu0 %vm267_vm0, %v5768_v6  ;;  %v5848_v5 = vld [vmem:[%s5498_s20 + $0x12a] sm:$0xff] }
  0x55   : > { %4697 = vmatmul.mubr.msk.f32.vlgmr.msra.gmra.mrb[0].mxu1 %vm267_vm0, %v199_v10  ;;  %4929 = vmatmul.mubr.msk.f32.gmra.mrb[16].mxu0 %vm267_vm0, %v5785_v11  ;;  %v5865_v10 = vld [vmem:[%s5498_s20 + $0x68] sm:$0xff] }
  0x56   : > { %5119 = vmatpush3.bf16.msra.mxu1 %v5509_v22  ;;  %4699 = vmatprep.mubr.msk.f32.mxu1 %vm267_vm0, %v5788_v12  ;;  %v5831_v22 = vld [vmem:[%s5498_s20 + $0x48] sm:$0xff]  ;;  %6628 = vst [vmem:[#allocation21_spill] sm:$0xff] %v5865_v10  ;;  %v5931_v12 = vld [vmem:[%s5498_s20 + $0xc0] sm:$0xff] }
  0x57   : > { %4931 = vmatprep.mubr.msk.f32.mxu0 %vm267_vm0, %v5793_v14  ;;  %5121 = vmatprep.subr.bf16.mxu1 %v5790_v13  ;;  %6625 = vst [vmem:[#allocation18_spill] sm:$0xff] %v5831_v22 }
  0x59   : > { %4700 = vmatmul.mubr.msk.f32.gmra.mrb[2].mxu1 %vm267_vm0, %v5802_v15  ;;  %4932 = vmatmul.mubr.msk.f32.gmra.mrb[18].mxu0 %vm267_vm0, %v5805_v16  ;;  %v5925_v15 = vld [vmem:[%s5498_s20 + $0xb0] sm:$0xff] }
  0x5a   : > { %4702 = vmatprep.mubr.msk.f32.mxu1 %vm267_vm0, %v5810_v17  ;;  %4934 = vmatprep.mubr.msk.f32.mxu0 %vm267_vm0, %v5813_v18  ;;  %6637 = vst [vmem:[#allocation30_spill] sm:$0xff] %v5925_v15 }
  0x5d   : > { %4703 = vmatmul.mubr.msk.f32.gmra.mrb[4].mxu1 %vm267_vm0, %v5825_v19  ;;  %4935 = vmatmul.mubr.msk.f32.gmra.mrb[20].mxu0 %vm267_vm0, %v5828_v21 }
  0x5e   : > { %4705 = vmatprep.mubr.msk.f32.mxu1 %vm267_vm0, %v5831_v22  ;;  %4937 = vmatprep.mubr.msk.f32.mxu0 %vm267_vm0, %v5834_v37 }
  0x61   : > { %4706 = vmatmul.mubr.msk.f32.gmra.mrb[6].mxu1 %vm267_vm0, %v5845_v38  ;;  %4938 = vmatmul.mubr.msk.f32.gmra.mrb[22].mxu0 %vm267_vm0, %v5848_v5 }
  0x62   : > { %4708 = vmatprep.mubr.msk.f32.mxu1 %vm267_vm0, %v5851_v8  ;;  %4940 = vmatprep.mubr.msk.f32.mxu0 %vm267_vm0, %v5854_v9 }
  0x65   : > { %4709 = vmatmul.mubr.msk.f32.gmra.mrb[8].mxu1 %vm267_vm0, %v5865_v10  ;;  %4941 = vmatmul.mubr.msk.f32.gmra.mrb[24].mxu0 %vm267_vm0, %v5868_v3 }
  0x66   : > { %4711 = vmatprep.mubr.msk.f32.mxu1 %vm267_vm0, %v5871_v1  ;;  %4943 = vmatprep.mubr.msk.f32.mxu0 %vm267_vm0, %v5874_v63 }
  0x69   : > { %4712 = vmatmul.mubr.msk.f32.gmra.mrb[10].mxu1 %vm267_vm0, %v5885_v61  ;;  %4944 = vmatmul.mubr.msk.f32.gmra.mrb[26].mxu0 %vm267_vm0, %v5888_v59 }
  0x6a   : > { %4714 = vmatprep.mubr.msk.f32.mxu1 %vm267_vm0, %v5891_v57  ;;  %4946 = vmatprep.mubr.msk.f32.mxu0 %vm267_vm0, %v5894_v55 }
  0x6d   : > { %4715 = vmatmul.mubr.msk.f32.gmra.mrb[12].mxu1 %vm267_vm0, %v5905_v53  ;;  %4947 = vmatmul.mubr.msk.f32.gmra.mrb[28].mxu0 %vm267_vm0, %v5908_v51  ;;  %v4296_v51 = vld [vmem:[%s6558_s1 + $0x88] sm:$0xff] }
  0x6e   : > { %4717 = vmatprep.mubr.msk.f32.mxu1 %vm267_vm0, %v5911_v49  ;;  %4949 = vmatprep.mubr.msk.f32.mxu0 %vm267_vm0, %v5914_v47  ;;  %v5948_v47 = vld [vmem:[%s5498_s20 + $0xc8] sm:$0xff]  ;;  %v5953_v55 = vpack.c.bf16 %v4296_v51, %v4295_v43  ;;  %v5968_v43 = vld [vmem:[%s5498_s20 + $0xf0] sm:$0xff] }
  0x6f   : > { %6639 = vst [vmem:[#allocation32_spill] sm:$0xff] %v5948_v47  ;;  %v5983_v51 = vld [vmem:[%s5498_s20 + $0x108] sm:$0xff] }
  0x71   : > { %4718 = vmatmul.mubr.msk.f32.gmra.mrb[14].mxu1 %vm267_vm0, %v5925_v15  ;;  %4950 = vmatmul.mubr.msk.f32.gmra.mrb[30].mxu0 %vm267_vm0, %v5928_v45  ;;  %v5963_v45 = vld [vmem:[%s5498_s20 + $0xe0] sm:$0xff] }
  0x72   : > { %4720 = vmatprep.mubr.msk.f32.mxu1 %vm267_vm0, %v5931_v12  ;;  %4956 = vmatprep.mubr.msk.f32.mxu0 %vm267_vm0, %v5810_v17 }
  0x75   : > { %4721 = vmatmul.mubr.msk.f32.gmra.mrb[16].mxu1 %vm267_vm0, %v5948_v47  ;;  %4957 = vmatmul.mubr.msk.f32.vlgmr.msra.gmra.mrb[0].mxu0 %vm267_vm0, %v5825_v19 }
  0x76   : > { %5139 = vmatpush3.bf16.msra.mxu0 %v5626_v41  ;;  %4723 = vmatprep.mubr.msk.f32.mxu1 %vm267_vm0, %v5951_v40  ;;  %v5980_v41 = vld [vmem:[%s5498_s20 + $0xf8] sm:$0xff] }
  0x77   : > { %4959 = vmatprep.mubr.msk.f32.mxu0 %vm267_vm0, %v5831_v22  ;;  %5141 = vmatprep.subr.bf16.mxu0 %v5953_v55  ;;  %v910_v22 = vld [vmem:[%s5498_s20 + $0x2] sm:$0xff] }
  0x79   : > { %4724 = vmatmul.mubr.msk.f32.gmra.mrb[18].mxu1 %vm267_vm0, %v5963_v45  ;;  %4960 = vmatmul.mubr.msk.f32.gmra.mrb[2].mxu0 %vm267_vm0, %v5845_v38  ;;  %v5994_v38 = vld [vmem:[%s5498_s20 + $0x110] sm:$0xff] }
  0x7a   : > { %4726 = vmatprep.mubr.msk.f32.mxu1 %vm267_vm0, %v5968_v43  ;;  %4962 = vmatprep.mubr.msk.f32.mxu0 %vm267_vm0, %v5851_v8  ;;  %v5997_v8 = vld [vmem:[%s5498_s20 + $0x120] sm:$0xff] }
  0x7d   : > { %4727 = vmatmul.mubr.msk.f32.gmra.mrb[20].mxu1 %vm267_vm0, %v5980_v41  ;;  %4963 = vmatmul.mubr.msk.f32.gmra.mrb[4].mxu0 %vm267_vm0, %v5865_v10  ;;  %v6008_v10 = vld [vmem:[%s5498_s20 + $0x128] sm:$0xff] }
  0x7e   : > { %4729 = vmatprep.mubr.msk.f32.mxu1 %vm267_vm0, %v5983_v51  ;;  %4965 = vmatprep.mubr.msk.f32.mxu0 %vm267_vm0, %v5871_v1  ;;  %v6011_v1 = vld [vmem:[%s5498_s20 + $0x138] sm:$0xff] }
  0x81   : > { %4730 = vmatmul.mubr.msk.f32.gmra.mrb[22].mxu1 %vm267_vm0, %v5994_v38  ;;  %4966 = vmatmul.mubr.msk.f32.gmra.mrb[6].mxu0 %vm267_vm0, %v5885_v61  ;;  %v6022_v61 = vld [vmem:[%s5498_s20 + $0x140] sm:$0xff] }
  0x82   : > { %4732 = vmatprep.mubr.msk.f32.mxu1 %vm267_vm0, %v5997_v8  ;;  %4968 = vmatprep.mubr.msk.f32.mxu0 %vm267_vm0, %v5891_v57  ;;  %v6025_v57 = vld [vmem:[%s5498_s20 + $0x150] sm:$0xff] }
  0x85   : > { %4733 = vmatmul.mubr.msk.f32.gmra.mrb[24].mxu1 %vm267_vm0, %v6008_v10  ;;  %4969 = vmatmul.mubr.msk.f32.gmra.mrb[8].mxu0 %vm267_vm0, %v5905_v53  ;;  %v6036_v53 = vld [vmem:[%s5498_s20 + $0x158] sm:$0xff] }
  0x86   : > { %4735 = vmatprep.mubr.msk.f32.mxu1 %vm267_vm0, %v6011_v1  ;;  %4971 = vmatprep.mubr.msk.f32.mxu0 %vm267_vm0, %v5911_v49  ;;  %v6039_v49 = vld [vmem:[%s5498_s20 + $0x168] sm:$0xff] }
  0x89   : > { %4736 = vmatmul.mubr.msk.f32.gmra.mrb[26].mxu1 %vm267_vm0, %v6022_v61  ;;  %4972 = vmatmul.mubr.msk.f32.gmra.mrb[10].mxu0 %vm267_vm0, %v5925_v15  ;;  %v6050_v15 = vld [vmem:[%s5498_s20 + $0x170] sm:$0xff] }
  0x8a   : > { %4738 = vmatprep.mubr.msk.f32.mxu1 %vm267_vm0, %v6025_v57  ;;  %4974 = vmatprep.mubr.msk.f32.mxu0 %vm267_vm0, %v5931_v12 }
  0x8d   : > { %4739 = vmatmul.mubr.msk.f32.gmra.mrb[28].mxu1 %vm267_vm0, %v6036_v53  ;;  %4975 = vmatmul.mubr.msk.f32.gmra.mrb[12].mxu0 %vm267_vm0, %v5948_v47  ;;  %v911_v47 = vld [vmem:[%s5498_s20 + $0xa] sm:$0xff] }
  0x8e   : > { %4741 = vmatprep.mubr.msk.f32.mxu1 %vm267_vm0, %v6039_v49  ;;  %4977 = vmatprep.mubr.msk.f32.mxu0 %vm267_vm0, %v5951_v40 }
  0x91   : > { %4742 = vmatmul.mubr.msk.f32.gmra.mrb[30].mxu1 %vm267_vm0, %v6050_v15  ;;  %4978 = vmatmul.mubr.msk.f32.gmra.mrb[14].mxu0 %vm267_vm0, %v5963_v45 }
  0x92   : > { %4748 = vmatprep.mubr.msk.f32.mxu1 %vm267_vm0, %v910_v22  ;;  %4980 = vmatprep.mubr.msk.f32.mxu0 %vm267_vm0, %v5968_v43  ;;  %v6658_v22 = vld [vmem:[#allocation22_spill] sm:$0xff] }
  0x95   : > { %4749 = vmatmul.mubr.msk.f32.vlgmr.msra.gmra.mrb[0].mxu1 %vm267_vm0, %v911_v47  ;;  %4981 = vmatmul.mubr.msk.f32.gmra.mrb[16].mxu0 %vm267_vm0, %v5980_v41  ;;  %v4161_v47 = vld [vmem:[%s5498_s20 + $0x198] sm:$0xff] }
  0x96   : > { %5123 = vmatpush3.bf16.msra.mxu1 %v5790_v13  ;;  %4751 = vmatprep.mubr.msk.f32.mxu1 %vm267_vm0, %v5604_v36  ;;  %v6103_v36 = vld [vmem:[%s5498_s20 + $0x180] sm:$0xff] }
  0x97   : > { %4983 = vmatprep.mubr.msk.f32.mxu0 %vm267_vm0, %v5983_v51  ;;  %5144 = vmatprep.subr.bf16.mxu1 %v5470_v7  ;;  %v4162_v13 = vld [vmem:[%s5498_s20 + $0x1a0] sm:$0xff] }
  0x99   : > { %4752 = vmatmul.mubr.msk.f32.gmra.mrb[2].mxu1 %vm267_vm0, %v5621_v39  ;;  %4984 = vmatmul.mubr.msk.f32.gmra.mrb[18].mxu0 %vm267_vm0, %v5994_v38  ;;  %v6114_v39 = vld [vmem:[%s5498_s20 + $0x188] sm:$0xff] }
  0x9a   : > { %4754 = vmatprep.mubr.msk.f32.mxu1 %vm267_vm0, %v5629_v42  ;;  %4986 = vmatprep.mubr.msk.f32.mxu0 %vm267_vm0, %v5997_v8 }
  0x9d   : > { %4755 = vmatmul.mubr.msk.f32.gmra.mrb[4].mxu1 %vm267_vm0, %v5641_v44  ;;  %4987 = vmatmul.mubr.msk.f32.gmra.mrb[20].mxu0 %vm267_vm0, %v6008_v10 }
  0x9e   : > { %4757 = vmatprep.mubr.msk.f32.mxu1 %vm267_vm0, %v5649_v46  ;;  %4989 = vmatprep.mubr.msk.f32.mxu0 %vm267_vm0, %v6011_v1 }
  0xa1   : > { %4758 = vmatmul.mubr.msk.f32.gmra.mrb[6].mxu1 %vm267_vm0, %v5664_v48  ;;  %4990 = vmatmul.mubr.msk.f32.gmra.mrb[22].mxu0 %vm267_vm0, %v6022_v61 }
  0xa2   : > { %4760 = vmatprep.mubr.msk.f32.mxu1 %vm267_vm0, %v5670_v50  ;;  %4992 = vmatprep.mubr.msk.f32.mxu0 %vm267_vm0, %v6025_v57 }
  0xa5   : > { %4761 = vmatmul.mubr.msk.f32.gmra.mrb[8].mxu1 %vm267_vm0, %v5684_v52  ;;  %4993 = vmatmul.mubr.msk.f32.gmra.mrb[24].mxu0 %vm267_vm0, %v6036_v53 }
  0xa6   : > { %4763 = vmatprep.mubr.msk.f32.mxu1 %vm267_vm0, %v5690_v54  ;;  %4995 = vmatprep.mubr.msk.f32.mxu0 %vm267_vm0, %v6039_v49 }
  0xa9   : > { %4764 = vmatmul.mubr.msk.f32.gmra.mrb[10].mxu1 %vm267_vm0, %v5704_v56  ;;  %4996 = vmatmul.mubr.msk.f32.gmra.mrb[26].mxu0 %vm267_vm0, %v6050_v15 }
  0xaa   : > { %4766 = vmatprep.mubr.msk.f32.mxu1 %vm267_vm0, %v5710_v58  ;;  %4998 = vmatprep.mubr.msk.f32.mxu0 %vm267_vm0, %v6103_v36 }
  0xad   : > { %4767 = vmatmul.mubr.msk.f32.gmra.mrb[12].mxu1 %vm267_vm0, %v5724_v60  ;;  %4999 = vmatmul.mubr.msk.f32.gmra.mrb[28].mxu0 %vm267_vm0, %v6114_v39 }
  0xae   : > { %4769 = vmatprep.mubr.msk.f32.mxu1 %vm267_vm0, %v5730_v62  ;;  %5001 = vmatprep.mubr.msk.f32.mxu0 %vm267_vm0, %v4161_v47  ;;  %v6659_v47 = vld [vmem:[#allocation12_spill] sm:$0xff] }
  0xb1   : > { %4770 = vmatmul.mubr.msk.f32.gmra.mrb[14].mxu1 %vm267_vm0, %v5744_v0  ;;  %5002 = vmatmul.mubr.msk.f32.gmra.mrb[30].mxu0 %vm267_vm0, %v4162_v13  ;;  %v6660_v13 = vld [vmem:[#allocation23_spill] sm:$0xff] }
  0xb2   : > { %4772 = vmatprep.mubr.msk.f32.mxu1 %vm267_vm0, %v5750_v2  ;;  %5008 = vmatprep.mubr.msk.f32.mxu0 %vm267_vm0, %v5507_v20  ;;  %v6640_v20 = vld [vmem:[#allocation25_spill] sm:$0xff] }
  0xb5   : > { %4773 = vmatmul.mubr.msk.f32.gmra.mrb[16].mxu1 %vm267_vm0, %v5764_v4  ;;  %5009 = vmatmul.mubr.msk.f32.vlgmr.msra.gmra.mrb[0].mxu0 %vm267_vm0, %v5514_v23  ;;  %v6641_v23 = vld [vmem:[#allocation2_spill] sm:$0xff] }
  0xb6   : > { %5143 = vmatpush3.bf16.msra.mxu0 %v5953_v55  ;;  %4775 = vmatprep.mubr.msk.f32.mxu1 %vm267_vm0, %v5768_v6  ;;  %v6655_v55 = vld [vmem:[#allocation10_spill] sm:$0xff] }
  0xb7   : > { %5011 = vmatprep.mubr.msk.f32.mxu0 %vm267_vm0, %v5520_v24  ;;  %v6642_v24 = vld [vmem:[#allocation27_spill] sm:$0xff] }
  0xb9   : > { %4776 = vmatmul.mubr.msk.f32.gmra.mrb[18].mxu1 %vm267_vm0, %v5785_v11  ;;  %5012 = vmatmul.mubr.msk.f32.gmra.mrb[2].mxu0 %vm267_vm0, %v5531_v25  ;;  %v6643_v25 = vld [vmem:[#allocation3_spill] sm:$0xff] }
  0xba   : > { %4778 = vmatprep.mubr.msk.f32.mxu1 %vm267_vm0, %v5793_v14  ;;  %5014 = vmatprep.mubr.msk.f32.mxu0 %vm267_vm0, %v5534_v26  ;;  %v6644_v26 = vld [vmem:[#allocation16_spill] sm:$0xff] }
  0xbd   : > { %4779 = vmatmul.mubr.msk.f32.gmra.mrb[20].mxu1 %vm267_vm0, %v5805_v16  ;;  %5015 = vmatmul.mubr.msk.f32.gmra.mrb[4].mxu0 %vm267_vm0, %v5545_v27  ;;  %v6645_v27 = vld [vmem:[#allocation4_spill] sm:$0xff] }
  0xbe   : > { %4781 = vmatprep.mubr.msk.f32.mxu1 %vm267_vm0, %v5813_v18  ;;  %5017 = vmatprep.mubr.msk.f32.mxu0 %vm267_vm0, %v5548_v28  ;;  %v6646_v28 = vld [vmem:[#allocation17_spill] sm:$0xff] }
  0xc1   : > { %4782 = vmatmul.mubr.msk.f32.gmra.mrb[22].mxu1 %vm267_vm0, %v5828_v21  ;;  %5018 = vmatmul.mubr.msk.f32.gmra.mrb[6].mxu0 %vm267_vm0, %v5559_v29  ;;  %v6647_v29 = vld [vmem:[#allocation5_spill] sm:$0xff] }
  0xc2   : > { %4784 = vmatprep.mubr.msk.f32.mxu1 %vm267_vm0, %v5834_v37  ;;  %5020 = vmatprep.mubr.msk.f32.mxu0 %vm267_vm0, %v5562_v30  ;;  %v6648_v30 = vld [vmem:[#allocation6_spill] sm:$0xff] }
  0xc5   : > { %4785 = vmatmul.mubr.msk.f32.gmra.mrb[24].mxu1 %vm267_vm0, %v5848_v5  ;;  %5021 = vmatmul.mubr.msk.f32.gmra.mrb[8].mxu0 %vm267_vm0, %v5573_v31  ;;  %v6649_v31 = vld [vmem:[#allocation7_spill] sm:$0xff] }
  0xc6   : > { %4787 = vmatprep.mubr.msk.f32.mxu1 %vm267_vm0, %v5854_v9  ;;  %5023 = vmatprep.mubr.msk.f32.mxu0 %vm267_vm0, %v5576_v32  ;;  %v6650_v32 = vld [vmem:[#allocation18_spill] sm:$0xff] }
  0xc9   : > { %4788 = vmatmul.mubr.msk.f32.gmra.mrb[26].mxu1 %vm267_vm0, %v5868_v3  ;;  %5024 = vmatmul.mubr.msk.f32.gmra.mrb[10].mxu0 %vm267_vm0, %v5587_v33  ;;  %v6651_v33 = vld [vmem:[#allocation8_spill] sm:$0xff] }
  0xca   : > { %4790 = vmatprep.mubr.msk.f32.mxu1 %vm267_vm0, %v5874_v63  ;;  %5026 = vmatprep.mubr.msk.f32.mxu0 %vm267_vm0, %v5590_v34  ;;  %v6653_v34 = vld [vmem:[#allocation9_spill] sm:$0xff] }
  0xcd   : > { %4791 = vmatmul.mubr.msk.f32.gmra.mrb[28].mxu1 %vm267_vm0, %v5888_v59  ;;  %5027 = vmatmul.mubr.msk.f32.gmra.mrb[12].mxu0 %vm267_vm0, %v5601_v35  ;;  %v6654_v35 = vld [vmem:[#allocation20_spill] sm:$0xff] }
  0xce   : > { %4793 = vmatprep.mubr.msk.f32.mxu1 %vm267_vm0, %v6640_v20  ;;  %5029 = vmatprep.mubr.msk.f32.mxu0 %vm267_vm0, %v6641_v23 }
  0xd1   : > { %4794 = vmatmul.mubr.msk.f32.gmra.mrb[30].mxu1 %vm267_vm0, %v6642_v24  ;;  %5030 = vmatmul.mubr.msk.f32.gmra.mrb[14].mxu0 %vm267_vm0, %v6643_v25  ;;  %v6667_v24 = vld [vmem:[#allocation30_spill] sm:$0xff] }
  0xd2   : > { %4800 = vmatprep.mubr.msk.f32.mxu1 %vm267_vm0, %v6644_v26  ;;  %5032 = vmatprep.mubr.msk.f32.mxu0 %vm267_vm0, %v6645_v27  ;;  %v6661_v26 = vld [vmem:[#allocation13_spill] sm:$0xff] }
  0xd5   : > { %4801 = vmatmul.mubr.msk.f32.vlgmr.msra.gmra.mrb[0].mxu1 %vm267_vm0, %v6646_v28  ;;  %5033 = vmatmul.mubr.msk.f32.gmra.mrb[16].mxu0 %vm267_vm0, %v6647_v29  ;;  %v6662_v28 = vld [vmem:[#allocation24_spill] sm:$0xff] }
  0xd6   : > { %5145 = vmatpush3.bf16.msra.mxu1 %v5470_v7  ;;  %4803 = vmatprep.mubr.msk.f32.mxu1 %vm267_vm0, %v5810_v17  ;;  %v6652_v7 = vld [vmem:[#allocation19_spill] sm:$0xff]  ;;  %v6656_v17 = vld [vmem:[#allocation21_spill] sm:$0xff] }
  0xd7   : > { %5035 = vmatprep.mubr.msk.f32.mxu0 %vm267_vm0, %v6648_v30 }
  0xd9   : > { %4804 = vmatmul.mubr.msk.f32.gmra.mrb[2].mxu1 %vm267_vm0, %v5825_v19  ;;  %5036 = vmatmul.mubr.msk.f32.gmra.mrb[18].mxu0 %vm267_vm0, %v6649_v31  ;;  %v6657_v19 = vld [vmem:[#allocation11_spill] sm:$0xff] }
  0xda   : > { %4806 = vmatprep.mubr.msk.f32.mxu1 %vm267_vm0, %v6650_v32  ;;  %5038 = vmatprep.mubr.msk.f32.mxu0 %vm267_vm0, %v6651_v33  ;;  %v6663_v32 = vld [vmem:[#allocation14_spill] sm:$0xff] }
  0xdd   : > { %4807 = vmatmul.mubr.msk.f32.gmra.mrb[4].mxu1 %vm267_vm0, %v6652_v7  ;;  %5039 = vmatmul.mubr.msk.f32.gmra.mrb[20].mxu0 %vm267_vm0, %v6653_v34  ;;  %v6239_v7 = vld [vmem:[%s5498_s20 + $0x181] sm:$0xff] }
  0xde   : > { %4809 = vmatprep.mubr.msk.f32.mxu1 %vm267_vm0, %v6654_v35  ;;  %5041 = vmatprep.mubr.msk.f32.mxu0 %vm267_vm0, %v6655_v55  ;;  %v6664_v35 = vld [vmem:[#allocation26_spill] sm:$0xff] }
  0xe1   : > { %4810 = vmatmul.mubr.msk.f32.gmra.mrb[6].mxu1 %vm267_vm0, %v6656_v17  ;;  %5042 = vmatmul.mubr.msk.f32.gmra.mrb[22].mxu0 %vm267_vm0, %v6657_v19  ;;  %v6665_v17 = vld [vmem:[#allocation15_spill] sm:$0xff] }
  0xe2   : > { %4812 = vmatprep.mubr.msk.f32.mxu1 %vm267_vm0, %v6658_v22  ;;  %5044 = vmatprep.mubr.msk.f32.mxu0 %vm267_vm0, %v6659_v47  ;;  %v6666_v22 = vld [vmem:[#allocation28_spill] sm:$0xff] }
  0xe5   : > { %4813 = vmatmul.mubr.msk.f32.gmra.mrb[8].mxu1 %vm267_vm0, %v6660_v13  ;;  %5045 = vmatmul.mubr.msk.f32.gmra.mrb[24].mxu0 %vm267_vm0, %v6661_v26  ;;  %v6250_v13 = vld [vmem:[%s5498_s20 + $0x189] sm:$0xff] }
  0xe6   : > { %4815 = vmatprep.mubr.msk.f32.mxu1 %vm267_vm0, %v6662_v28  ;;  %5047 = vmatprep.mubr.msk.f32.mxu0 %vm267_vm0, %v6663_v32  ;;  %v4227_v28 = vld [vmem:[%s5498_s20 + $0x199] sm:$0xff] }
  0xe9   : > { %4816 = vmatmul.mubr.msk.f32.gmra.mrb[10].mxu1 %vm267_vm0, %v6664_v35  ;;  %5048 = vmatmul.mubr.msk.f32.gmra.mrb[26].mxu0 %vm267_vm0, %v6665_v17  ;;  %v4228_v35 = vld [vmem:[%s5498_s20 + $0x1a1] sm:$0xff]  ;;  %v6668_v17 = vld [vmem:[#allocation32_spill] sm:$0xff] }
  0xea   : > { %4818 = vmatprep.mubr.msk.f32.mxu1 %vm267_vm0, %v6666_v22  ;;  %5050 = vmatprep.mubr.msk.f32.mxu0 %vm267_vm0, %v6239_v7 }
  0xed   : > { %4819 = vmatmul.mubr.msk.f32.gmra.mrb[12].mxu1 %vm267_vm0, %v6667_v24  ;;  %5051 = vmatmul.mubr.msk.f32.gmra.mrb[28].mxu0 %vm267_vm0, %v6250_v13 }
  0xee   : > { %4821 = vmatprep.mubr.msk.f32.mxu1 %vm267_vm0, %v5931_v12  ;;  %5053 = vmatprep.mubr.msk.f32.mxu0 %vm267_vm0, %v4227_v28  ;;  %v6412_v12 = vld [vmem:[%s6560_s3] ss:$0 sm:$0xff] }
  0xf1   : > { %4822 = vmatmul.mubr.msk.f32.gmra.mrb[14].mxu1 %vm267_vm0, %v6668_v17  ;;  %5054 = vmatmul.mubr.msk.f32.gmra.mrb[30].mxu0 %vm267_vm0, %v4228_v35 }
  0xf2   : > { %4824 = vmatprep.mubr.msk.f32.mxu1 %vm267_vm0, %v5951_v40  ;;  %5060 = vmatprep.mubr.msk.f32.mxu0 %vm267_vm0, %v5629_v42  ;;  %v6669_v40 = vld [vmem:[#allocation27_spill] sm:$0xff]  ;;  %v6670_v42 = vld [vmem:[#allocation29_spill] sm:$0xff] }
  0xf5   : > { %4825 = vmatmul.mubr.msk.f32.gmra.mrb[16].mxu1 %vm267_vm0, %v5963_v45  ;;  %5061 = vmatmul.mubr.msk.f32.vlgmr.msra.gmra.mrb[0].mxu0 %vm267_vm0, %v5641_v44  ;;  %v4293_v44 = vld [vmem:[%s5498_s20 + $0x19a] sm:$0xff]  ;;  %v6671_v45 = vld [vmem:[#allocation15_spill] sm:$0xff] }
  0xf6   : > { %4827 = vmatprep.mubr.msk.f32.mxu1 %vm267_vm0, %v5968_v43  ;;  %5063 = vmatprep.mubr.msk.f32.mxu0 %vm267_vm0, %v5649_v46  ;;  %v6672_v46 = vld [vmem:[#allocation31_spill] sm:$0xff] }
  0xf9   : > { %4828 = vmatmul.mubr.msk.f32.gmra.mrb[18].mxu1 %vm267_vm0, %v5980_v41  ;;  %5064 = vmatmul.mubr.msk.f32.gmra.mrb[2].mxu0 %vm267_vm0, %v5664_v48  ;;  %v4294_v48 = vld [vmem:[%s5498_s20 + $0x1a2] sm:$0xff] }
  0xfa   : > { %4830 = vmatprep.mubr.msk.f32.mxu1 %vm267_vm0, %v5983_v51  ;;  %5066 = vmatprep.mubr.msk.f32.mxu0 %vm267_vm0, %v5670_v50 }
  0xfd   : > { %4831 = vmatmul.mubr.msk.f32.gmra.mrb[20].mxu1 %vm267_vm0, %v5994_v38  ;;  %5067 = vmatmul.mubr.msk.f32.gmra.mrb[4].mxu0 %vm267_vm0, %v5684_v52 }
  0xfe   : > { %4833 = vmatprep.mubr.msk.f32.mxu1 %vm267_vm0, %v5997_v8  ;;  %5069 = vmatprep.mubr.msk.f32.mxu0 %vm267_vm0, %v5690_v54 }
 0x101   : > { %4834 = vmatmul.mubr.msk.f32.gmra.mrb[22].mxu1 %vm267_vm0, %v6008_v10  ;;  %5070 = vmatmul.mubr.msk.f32.gmra.mrb[6].mxu0 %vm267_vm0, %v5704_v56 }
 0x102   : > { %4836 = vmatprep.mubr.msk.f32.mxu1 %vm267_vm0, %v6011_v1  ;;  %5072 = vmatprep.mubr.msk.f32.mxu0 %vm267_vm0, %v5710_v58 }
 0x105   : > { %4837 = vmatmul.mubr.msk.f32.gmra.mrb[24].mxu1 %vm267_vm0, %v6022_v61  ;;  %5073 = vmatmul.mubr.msk.f32.gmra.mrb[8].mxu0 %vm267_vm0, %v5724_v60 }
 0x106   : > { %4839 = vmatprep.mubr.msk.f32.mxu1 %vm267_vm0, %v6025_v57  ;;  %5075 = vmatprep.mubr.msk.f32.mxu0 %vm267_vm0, %v5730_v62 }
 0x109   : > { %4840 = vmatmul.mubr.msk.f32.gmra.mrb[26].mxu1 %vm267_vm0, %v6036_v53  ;;  %5076 = vmatmul.mubr.msk.f32.gmra.mrb[10].mxu0 %vm267_vm0, %v5744_v0 }
 0x10a   : > { %4842 = vmatprep.mubr.msk.f32.mxu1 %vm267_vm0, %v6039_v49  ;;  %5078 = vmatprep.mubr.msk.f32.mxu0 %vm267_vm0, %v5750_v2 }
 0x10d   : > { %4843 = vmatmul.mubr.msk.f32.gmra.mrb[28].mxu1 %vm267_vm0, %v6050_v15  ;;  %5079 = vmatmul.mubr.msk.f32.gmra.mrb[12].mxu0 %vm267_vm0, %v5764_v4  ;;  %v6407_v4 = vld [vmem:[%s6559_s2] ss:$0 sm:$0xff] }
 0x10e   : > { %4845 = vmatprep.mubr.msk.f32.mxu1 %vm267_vm0, %v6103_v36  ;;  %5081 = vmatprep.mubr.msk.f32.mxu0 %vm267_vm0, %v5768_v6 }
 0x111   : > { %4846 = vmatmul.mubr.msk.f32.gmra.mrb[30].mxu1 %vm267_vm0, %v6114_v39  ;;  %5082 = vmatmul.mubr.msk.f32.gmra.mrb[14].mxu0 %vm267_vm0, %v5785_v11 }
 0x112   : > { %4876 = vmatprep.mubr.msk.f32.mxu1 %vm267_vm0, %v6641_v23  ;;  %5084 = vmatprep.mubr.msk.f32.mxu0 %vm267_vm0, %v5793_v14 }
 0x115   : > { %4877 = vmatmul.mubr.msk.f32.vlgmr.msra.gmra.mrb[16].mxu1 %vm267_vm0, %v6643_v25  ;;  %5085 = vmatmul.mubr.msk.f32.gmra.mrb[16].mxu0 %vm267_vm0, %v5805_v16 }
 0x116   : > { %4879 = vmatprep.mubr.msk.f32.mxu1 %vm267_vm0, %v6645_v27  ;;  %5087 = vmatprep.mubr.msk.f32.mxu0 %vm267_vm0, %v5813_v18 }
 0x119   : > { %4880 = vmatmul.mubr.msk.f32.gmra.mrb[18].mxu1 %vm267_vm0, %v6647_v29  ;;  %5088 = vmatmul.mubr.msk.f32.gmra.mrb[18].mxu0 %vm267_vm0, %v5828_v21 }
 0x11a   : > { %4882 = vmatprep.mubr.msk.f32.mxu1 %vm267_vm0, %v6648_v30  ;;  %5090 = vmatprep.mubr.msk.f32.mxu0 %vm267_vm0, %v5834_v37 }
 0x11d   : > { %4883 = vmatmul.mubr.msk.f32.gmra.mrb[20].mxu1 %vm267_vm0, %v6649_v31  ;;  %5091 = vmatmul.mubr.msk.f32.gmra.mrb[20].mxu0 %vm267_vm0, %v5848_v5 }
 0x11e   : > { %4885 = vmatprep.mubr.msk.f32.mxu1 %vm267_vm0, %v6651_v33  ;;  %5093 = vmatprep.mubr.msk.f32.mxu0 %vm267_vm0, %v5854_v9 }
 0x121   : > { %4886 = vmatmul.mubr.msk.f32.gmra.mrb[22].mxu1 %vm267_vm0, %v6653_v34  ;;  %5094 = vmatmul.mubr.msk.f32.gmra.mrb[22].mxu0 %vm267_vm0, %v5868_v3 }
 0x122   : > { %4888 = vmatprep.mubr.msk.f32.mxu1 %vm267_vm0, %v6655_v55  ;;  %5096 = vmatprep.mubr.msk.f32.mxu0 %vm267_vm0, %v5874_v63 }
 0x125   : > { %4889 = vmatmul.mubr.msk.f32.gmra.mrb[24].mxu1 %vm267_vm0, %v6657_v19  ;;  %5097 = vmatmul.mubr.msk.f32.gmra.mrb[24].mxu0 %vm267_vm0, %v5888_v59 }
 0x126   : > { %4891 = vmatprep.mubr.msk.f32.mxu1 %vm267_vm0, %v6659_v47  ;;  %5099 = vmatprep.mubr.msk.f32.mxu0 %vm267_vm0, %v6640_v20 }
 0x129   : > { %4892 = vmatmul.mubr.msk.f32.gmra.mrb[26].mxu1 %vm267_vm0, %v6661_v26  ;;  %5100 = vmatmul.mubr.msk.f32.gmra.mrb[26].mxu0 %vm267_vm0, %v6669_v40 }
 0x12a   : > { %4894 = vmatprep.mubr.msk.f32.mxu1 %vm267_vm0, %v6663_v32  ;;  %5102 = vmatprep.mubr.msk.f32.mxu0 %vm267_vm0, %v6670_v42 }
 0x12d   : > { %4895 = vmatmul.mubr.msk.f32.gmra.mrb[28].mxu1 %vm267_vm0, %v6671_v45  ;;  %5103 = vmatmul.mubr.msk.f32.gmra.mrb[28].mxu0 %vm267_vm0, %v6672_v46 }
 0x12e   : > { %4897 = vmatprep.mubr.msk.f32.mxu1 %vm267_vm0, %v6239_v7  ;;  %5105 = vmatprep.mubr.msk.f32.mxu0 %vm267_vm0, %v4293_v44 }
 0x131   : > { %4898 = vmatmul.mubr.msk.f32.gmra.mrb[30].mxu1 %vm267_vm0, %v6250_v13  ;;  %5106 = vmatmul.mubr.msk.f32.gmra.mrb[30].mxu0 %vm267_vm0, %v4294_v48 }
 0x1a8   : > { %v4802_v49 = vpop.f32.mrb[0].mxu1 }
 0x1a9   : > { %v1496_v50 = vpop.f32.mrb[1].mxu1 }
 0x1ac   : > { %v4805_v52 = vpop.f32.mrb[2].mxu1 }
 0x1ad   : > { %v1506_v53 = vpop.f32.mrb[3].mxu1 }
 0x1b0   : > { %v4808_v54 = vpop.f32.mrb[4].mxu1 }
 0x1b1   : > { %v1516_v56 = vpop.f32.mrb[5].mxu1 }
 0x1b4   : > { %v4811_v57 = vpop.f32.mrb[6].mxu1 }
 0x1b5   : > { %v1526_v58 = vpop.f32.mrb[7].mxu1 }
 0x1b8   : > { %v4814_v59 = vpop.f32.mrb[8].mxu1 }
 0x1b9   : > { %v1536_v60 = vpop.f32.mrb[9].mxu1 }
 0x1bc   : > { %v6392_v61 = vpop.f32.mrb[10].mxu1 }
 0x1bd   : > { %v6394_v62 = vpop.f32.mrb[11].mxu1 }
 0x1c0   : > { %v6396_v63 = vpop.f32.mrb[12].mxu1 }
 0x1c1   : > { %v6398_v0 = vpop.f32.mrb[13].mxu1 }
 0x1c4   : > { %v6400_v1 = vpop.f32.mrb[14].mxu1 }
 0x1c5   : > { %v6402_v2 = vpop.f32.mrb[15].mxu1 }
 0x1c8   : > { %v5062_v3 = vpop.f32.mrb[0].mxu0 }
 0x1c9   : > { %v5146_v6 = vadd.f32 %v5062_v3, %v4802_v49  ;;  %v3437_v11 = vpop.f32.mrb[1].mxu0 }
 0x1ca   : > { %v5147_v14 = vadd.f32 %v3437_v11, %v1496_v50 }
 0x1cb   : > { %v3636_v15 = vmul.f32 %v5146_v6, %v6407_v4 }
 0x1cc   : > { %v3635_v16 = vmul.f32 %v5147_v14, %v6407_v4  ;;  %v5065_v18 = vpop.f32.mrb[2].mxu0 }
 0x1cd   : > { %v3675_v21 = vadd.f32 %v6412_v12, %v3636_v15  ;;  %v5148_v37 = vadd.f32 %v5065_v18, %v4805_v52  ;;  %v3447_v38 = vpop.f32.mrb[3].mxu0 }
 0x1ce   : > { %v3674_v5 = vadd.f32 %v6412_v12, %v3635_v16  ;;  %v5149_v8 = vadd.f32 %v3447_v38, %v1506_v53 }
 0x1cf   : > { %v3707_v9 = vmax.f32 %v3675_v21, 0.0  ;;  %v3638_v10 = vmul.f32 %v5148_v37, %v6407_v4 }
 0x1d0   : > { %v3706_v43 = vmax.f32 %v3674_v5, 0.0  ;;  %v3637_v41 = vmul.f32 %v5149_v8, %v6407_v4  ;;  %v5068_v51 = vpop.f32.mrb[4].mxu0 }
 0x1d1   : > { %3739 = vst.msk [vmem:[%s6421_s14 + $0x8] sm:$0xff] %vm267_vm0, %v3707_v9  ;;  %v3677_v36 = vadd.f32 %v6412_v12, %v3638_v10  ;;  %v5150_v39 = vadd.f32 %v5068_v51, %v4808_v54  ;;  %v3457_v20 = vpop.f32.mrb[5].mxu0 }
 0x1d2   : > { %3738 = vst.msk [vmem:[%s6421_s14] sm:$0xff] %vm267_vm0, %v3706_v43  ;;  %v3676_v23 = vadd.f32 %v6412_v12, %v3637_v41  ;;  %v5151_v24 = vadd.f32 %v3457_v20, %v1516_v56 }
 0x1d3   : > { %v3709_v25 = vmax.f32 %v3677_v36, 0.0  ;;  %v3640_v27 = vmul.f32 %v5150_v39, %v6407_v4 }
 0x1d4   : > { %v3708_v29 = vmax.f32 %v3676_v23, 0.0  ;;  %v3639_v30 = vmul.f32 %v5151_v24, %v6407_v4  ;;  %v5071_v31 = vpop.f32.mrb[6].mxu0 }
 0x1d5   : > { %3741 = vst.msk [vmem:[%s6421_s14 + $0x18] sm:$0xff] %vm267_vm0, %v3709_v25  ;;  %v3679_v33 = vadd.f32 %v6412_v12, %v3640_v27  ;;  %v5152_v34 = vadd.f32 %v5071_v31, %v4811_v57  ;;  %v3467_v55 = vpop.f32.mrb[7].mxu0 }
 0x1d6   : > { %3740 = vst.msk [vmem:[%s6421_s14 + $0x10] sm:$0xff] %vm267_vm0, %v3708_v29  ;;  %v3678_v19 = vadd.f32 %v6412_v12, %v3639_v30  ;;  %v5153_v47 = vadd.f32 %v3467_v55, %v1526_v58 }
 0x1d7   : > { %v3711_v26 = vmax.f32 %v3679_v33, 0.0  ;;  %v3642_v32 = vmul.f32 %v5152_v34, %v6407_v4 }
 0x1d8   : > { %v3710_v7 = vmax.f32 %v3678_v19, 0.0  ;;  %v3641_v17 = vmul.f32 %v5153_v47, %v6407_v4  ;;  %v5074_v22 = vpop.f32.mrb[8].mxu0 }
 0x1d9   : > { %3743 = vst.msk [vmem:[%s6421_s14 + $0x28] sm:$0xff] %vm267_vm0, %v3711_v26  ;;  %v3681_v13 = vadd.f32 %v6412_v12, %v3642_v32  ;;  %v5154_v28 = vadd.f32 %v5074_v22, %v4814_v59  ;;  %v3477_v35 = vpop.f32.mrb[9].mxu0 }
 0x1da   : > { %3742 = vst.msk [vmem:[%s6421_s14 + $0x20] sm:$0xff] %vm267_vm0, %v3710_v7  ;;  %v3680_v40 = vadd.f32 %v6412_v12, %v3641_v17  ;;  %v5155_v42 = vadd.f32 %v3477_v35, %v1536_v60 }
 0x1db   : > { %v3713_v44 = vmax.f32 %v3681_v13, 0.0  ;;  %v3644_v45 = vmul.f32 %v5154_v28, %v6407_v4 }
 0x1dc   : > { %v3712_v46 = vmax.f32 %v3680_v40, 0.0  ;;  %v3643_v48 = vmul.f32 %v5155_v42, %v6407_v4  ;;  %v5077_v49 = vpop.f32.mrb[10].mxu0 }
 0x1dd   : > { %3745 = vst.msk [vmem:[%s6421_s14 + $0x38] sm:$0xff] %vm267_vm0, %v3713_v44  ;;  %v3683_v50 = vadd.f32 %v6412_v12, %v3644_v45  ;;  %v5156_v52 = vadd.f32 %v5077_v49, %v6392_v61  ;;  %v3487_v53 = vpop.f32.mrb[11].mxu0 }
 0x1de   : > { %3744 = vst.msk [vmem:[%s6421_s14 + $0x30] sm:$0xff] %vm267_vm0, %v3712_v46  ;;  %v3682_v54 = vadd.f32 %v6412_v12, %v3643_v48  ;;  %v5157_v56 = vadd.f32 %v3487_v53, %v6394_v62 }
 0x1df   : > { %v3715_v57 = vmax.f32 %v3683_v50, 0.0  ;;  %v3646_v58 = vmul.f32 %v5156_v52, %v6407_v4 }
 0x1e0   : > { %v3714_v59 = vmax.f32 %v3682_v54, 0.0  ;;  %v3645_v60 = vmul.f32 %v5157_v56, %v6407_v4  ;;  %v5080_v3 = vpop.f32.mrb[12].mxu0 }
 0x1e1   : > { %3747 = vst.msk [vmem:[%s6421_s14 + $0x48] sm:$0xff] %vm267_vm0, %v3715_v57  ;;  %v3685_v61 = vadd.f32 %v6412_v12, %v3646_v58  ;;  %v5158_v6 = vadd.f32 %v5080_v3, %v6396_v63  ;;  %v3497_v11 = vpop.f32.mrb[13].mxu0 }
 0x1e2   : > { %3746 = vst.msk [vmem:[%s6421_s14 + $0x40] sm:$0xff] %vm267_vm0, %v3714_v59  ;;  %v3684_v62 = vadd.f32 %v6412_v12, %v3645_v60  ;;  %v5159_v14 = vadd.f32 %v3497_v11, %v6398_v0 }
 0x1e3   : > { %v3717_v15 = vmax.f32 %v3685_v61, 0.0  ;;  %v3648_v16 = vmul.f32 %v5158_v6, %v6407_v4 }
 0x1e4   : > { %v3716_v18 = vmax.f32 %v3684_v62, 0.0  ;;  %v3647_v21 = vmul.f32 %v5159_v14, %v6407_v4  ;;  %v5083_v37 = vpop.f32.mrb[14].mxu0 }
 0x1e5   : > { %3749 = vst.msk [vmem:[%s6421_s14 + $0x58] sm:$0xff] %vm267_vm0, %v3717_v15  ;;  %v3687_v38 = vadd.f32 %v6412_v12, %v3648_v16  ;;  %v5160_v63 = vadd.f32 %v5083_v37, %v6400_v1  ;;  %v3507_v5 = vpop.f32.mrb[15].mxu0 }
 0x1e6   : > { %3748 = vst.msk [vmem:[%s6421_s14 + $0x50] sm:$0xff] %vm267_vm0, %v3716_v18  ;;  %v3686_v0 = vadd.f32 %v6412_v12, %v3647_v21  ;;  %v5161_v8 = vadd.f32 %v3507_v5, %v6402_v2 }
 0x1e7   : > { %v3719_v9 = vmax.f32 %v3687_v38, 0.0  ;;  %v3650_v10 = vmul.f32 %v5160_v63, %v6407_v4 }
 0x1e8   : > { %v3718_v43 = vmax.f32 %v3686_v0, 0.0  ;;  %v3649_v41 = vmul.f32 %v5161_v8, %v6407_v4  ;;  %v4878_v51 = vpop.f32.mrb[16].mxu1  ;;  %v5086_v36 = vpop.f32.mrb[16].mxu0 }
 0x1e9   : > { %3751 = vst.msk [vmem:[%s6421_s14 + $0x68] sm:$0xff] %vm267_vm0, %v3719_v9  ;;  %v3689_v1 = vadd.f32 %v6412_v12, %v3650_v10  ;;  %v5162_v39 = vadd.f32 %v5086_v36, %v4878_v51  ;;  %v1964_v20 = vpop.f32.mrb[17].mxu1  ;;  %v3517_v23 = vpop.f32.mrb[17].mxu0 }
 0x1ea   : > { %3750 = vst.msk [vmem:[%s6421_s14 + $0x60] sm:$0xff] %vm267_vm0, %v3718_v43  ;;  %v3688_v2 = vadd.f32 %v6412_v12, %v3649_v41  ;;  %v5163_v24 = vadd.f32 %v3517_v23, %v1964_v20 }
 0x1eb   : > { %v3721_v25 = vmax.f32 %v3689_v1, 0.0  ;;  %v3652_v27 = vmul.f32 %v5162_v39, %v6407_v4 }
 0x1ec   : > { %v3720_v29 = vmax.f32 %v3688_v2, 0.0  ;;  %v3651_v30 = vmul.f32 %v5163_v24, %v6407_v4  ;;  %v4881_v31 = vpop.f32.mrb[18].mxu1  ;;  %v5089_v33 = vpop.f32.mrb[18].mxu0 }
 0x1ed   : > { %3753 = vst.msk [vmem:[%s6421_s14 + $0x78] sm:$0xff] %vm267_vm0, %v3721_v25  ;;  %v3691_v34 = vadd.f32 %v6412_v12, %v3652_v27  ;;  %v5164_v55 = vadd.f32 %v5089_v33, %v4881_v31  ;;  %v1974_v19 = vpop.f32.mrb[19].mxu1  ;;  %v3527_v47 = vpop.f32.mrb[19].mxu0 }
 0x1ee   : > { %3752 = vst.msk [vmem:[%s6421_s14 + $0x70] sm:$0xff] %vm267_vm0, %v3720_v29  ;;  %v3690_v26 = vadd.f32 %v6412_v12, %v3651_v30  ;;  %v5165_v32 = vadd.f32 %v3527_v47, %v1974_v19 }
 0x1ef   : > { %v3723_v7 = vmax.f32 %v3691_v34, 0.0  ;;  %v3654_v17 = vmul.f32 %v5164_v55, %v6407_v4 }
 0x1f0   : > { %v3722_v22 = vmax.f32 %v3690_v26, 0.0  ;;  %v3653_v13 = vmul.f32 %v5165_v32, %v6407_v4  ;;  %v4884_v28 = vpop.f32.mrb[20].mxu1  ;;  %v5092_v35 = vpop.f32.mrb[20].mxu0 }
 0x1f1   : > { %3755 = vst.msk [vmem:[%s6421_s14 + $0x88] sm:$0xff] %vm267_vm0, %v3723_v7  ;;  %v3693_v40 = vadd.f32 %v6412_v12, %v3654_v17  ;;  %v5166_v42 = vadd.f32 %v5092_v35, %v4884_v28  ;;  %v1984_v44 = vpop.f32.mrb[21].mxu1  ;;  %v3537_v45 = vpop.f32.mrb[21].mxu0 }
 0x1f2   : > { %3754 = vst.msk [vmem:[%s6421_s14 + $0x80] sm:$0xff] %vm267_vm0, %v3722_v22  ;;  %v3692_v46 = vadd.f32 %v6412_v12, %v3653_v13  ;;  %v5167_v48 = vadd.f32 %v3537_v45, %v1984_v44 }
 0x1f3   : > { %v3725_v49 = vmax.f32 %v3693_v40, 0.0  ;;  %v3656_v50 = vmul.f32 %v5166_v42, %v6407_v4 }
 0x1f4   : > { %v3724_v52 = vmax.f32 %v3692_v46, 0.0  ;;  %v3655_v53 = vmul.f32 %v5167_v48, %v6407_v4  ;;  %v4887_v54 = vpop.f32.mrb[22].mxu1  ;;  %v5095_v56 = vpop.f32.mrb[22].mxu0 }
 0x1f5   : > { %3757 = vst.msk [vmem:[%s6421_s14 + $0x98] sm:$0xff] %vm267_vm0, %v3725_v49  ;;  %v3695_v57 = vadd.f32 %v6412_v12, %v3656_v50  ;;  %v5168_v58 = vadd.f32 %v5095_v56, %v4887_v54  ;;  %v1994_v59 = vpop.f32.mrb[23].mxu1  ;;  %v3547_v60 = vpop.f32.mrb[23].mxu0 }
 0x1f6   : > { %3756 = vst.msk [vmem:[%s6421_s14 + $0x90] sm:$0xff] %vm267_vm0, %v3724_v52  ;;  %v3694_v3 = vadd.f32 %v6412_v12, %v3655_v53  ;;  %v5169_v61 = vadd.f32 %v3547_v60, %v1994_v59 }
 0x1f7   : > { %v3727_v6 = vmax.f32 %v3695_v57, 0.0  ;;  %v3658_v11 = vmul.f32 %v5168_v58, %v6407_v4 }
 0x1f8   : > { %v3726_v62 = vmax.f32 %v3694_v3, 0.0  ;;  %v3657_v14 = vmul.f32 %v5169_v61, %v6407_v4  ;;  %v4890_v15 = vpop.f32.mrb[24].mxu1  ;;  %v5098_v16 = vpop.f32.mrb[24].mxu0 }
 0x1f9   : > { %3759 = vst.msk [vmem:[%s6421_s14 + $0xa8] sm:$0xff] %vm267_vm0, %v3727_v6  ;;  %v3697_v18 = vadd.f32 %v6412_v12, %v3658_v11  ;;  %v5170_v21 = vadd.f32 %v5098_v16, %v4890_v15  ;;  %v2004_v37 = vpop.f32.mrb[25].mxu1  ;;  %v3557_v38 = vpop.f32.mrb[25].mxu0 }
 0x1fa   : > { %3758 = vst.msk [vmem:[%s6421_s14 + $0xa0] sm:$0xff] %vm267_vm0, %v3726_v62  ;;  %v3696_v63 = vadd.f32 %v6412_v12, %v3657_v14  ;;  %v5171_v5 = vadd.f32 %v3557_v38, %v2004_v37 }
 0x1fb   : > { %v3729_v0 = vmax.f32 %v3697_v18, 0.0  ;;  %v3660_v8 = vmul.f32 %v5170_v21, %v6407_v4 }
 0x1fc   : > { %v3728_v9 = vmax.f32 %v3696_v63, 0.0  ;;  %v3659_v10 = vmul.f32 %v5171_v5, %v6407_v4  ;;  %v4893_v43 = vpop.f32.mrb[26].mxu1  ;;  %v5101_v41 = vpop.f32.mrb[26].mxu0 }
 0x1fd   : > { %3761 = vst.msk [vmem:[%s6421_s14 + $0xb8] sm:$0xff] %vm267_vm0, %v3729_v0  ;;  %v3699_v51 = vadd.f32 %v6412_v12, %v3660_v8  ;;  %v5172_v36 = vadd.f32 %v5101_v41, %v4893_v43  ;;  %v2014_v1 = vpop.f32.mrb[27].mxu1  ;;  %v3567_v39 = vpop.f32.mrb[27].mxu0 }
 0x1fe   : > { %3760 = vst.msk [vmem:[%s6421_s14 + $0xb0] sm:$0xff] %vm267_vm0, %v3728_v9  ;;  %v3698_v20 = vadd.f32 %v6412_v12, %v3659_v10  ;;  %v5173_v23 = vadd.f32 %v3567_v39, %v2014_v1 }
 0x1ff   : > { %v3731_v2 = vmax.f32 %v3699_v51, 0.0  ;;  %v3662_v24 = vmul.f32 %v5172_v36, %v6407_v4 }
 0x200   : > { %v3730_v25 = vmax.f32 %v3698_v20, 0.0  ;;  %v3661_v27 = vmul.f32 %v5173_v23, %v6407_v4  ;;  %v4896_v29 = vpop.f32.mrb[28].mxu1  ;;  %v5104_v30 = vpop.f32.mrb[28].mxu0 }
 0x201   : > { %3763 = vst.msk [vmem:[%s6421_s14 + $0xc8] sm:$0xff] %vm267_vm0, %v3731_v2  ;;  %v3701_v31 = vadd.f32 %v6412_v12, %v3662_v24  ;;  %v5174_v33 = vadd.f32 %v5104_v30, %v4896_v29  ;;  %v2024_v34 = vpop.f32.mrb[29].mxu1  ;;  %v3577_v55 = vpop.f32.mrb[29].mxu0 }
 0x202   : > { %3762 = vst.msk [vmem:[%s6421_s14 + $0xc0] sm:$0xff] %vm267_vm0, %v3730_v25  ;;  %v3700_v19 = vadd.f32 %v6412_v12, %v3661_v27  ;;  %v5175_v47 = vadd.f32 %v3577_v55, %v2024_v34 }
 0x203   : > { %v3733_v26 = vmax.f32 %v3701_v31, 0.0  ;;  %v3664_v32 = vmul.f32 %v5174_v33, %v6407_v4 }
 0x204   : > { %v3732_v7 = vmax.f32 %v3700_v19, 0.0  ;;  %v3663_v17 = vmul.f32 %v5175_v47, %v6407_v4  ;;  %v4899_v22 = vpop.f32.mrb[30].mxu1  ;;  %v5107_v13 = vpop.f32.mrb[30].mxu0 }
 0x205   : > { %3765 = vst.msk [vmem:[%s6421_s14 + $0xd8] sm:$0xff] %vm267_vm0, %v3733_v26  ;;  %v3703_v28 = vadd.f32 %v6412_v12, %v3664_v32  ;;  %v5176_v35 = vadd.f32 %v5107_v13, %v4899_v22  ;;  %v2034_v40 = vpop.f32.mrb[31].mxu1  ;;  %v3587_v42 = vpop.f32.mrb[31].mxu0 }
 0x206   : > { %3764 = vst.msk [vmem:[%s6421_s14 + $0xd0] sm:$0xff] %vm267_vm0, %v3732_v7  ;;  %v3702_v44 = vadd.f32 %v6412_v12, %v3663_v17  ;;  %v5177_v45 = vadd.f32 %v3587_v42, %v2034_v40 }
 0x207   : > { %v3735_v46 = vmax.f32 %v3703_v28, 0.0  ;;  %v3666_v48 = vmul.f32 %v5176_v35, %v6407_v4 }
 0x208   : > { %v3734_v49 = vmax.f32 %v3702_v44, 0.0  ;;  %v3665_v50 = vmul.f32 %v5177_v45, %v6407_v4 }
 0x209   : > { %3767 = vst.msk [vmem:[%s6421_s14 + $0xe8] sm:$0xff] %vm267_vm0, %v3735_v46  ;;  %v3705_v52 = vadd.f32 %v6412_v12, %v3666_v48 }
 0x20a   : > { %3766 = vst.msk [vmem:[%s6421_s14 + $0xe0] sm:$0xff] %vm267_vm0, %v3734_v49  ;;  %v3704_v53 = vadd.f32 %v6412_v12, %v3665_v50 }
 0x20b   : > { %v3737_v54 = vmax.f32 %v3705_v52, 0.0 }
 0x20c   : > { %v3736_v56 = vmax.f32 %v3704_v53, 0.0 }
 0x20d   : > { %3769 = vst.msk [vmem:[%s6421_s14 + $0xf8] sm:$0xff] %vm267_vm0, %v3737_v54 }
 0x20e   : > { %3768 = vst.msk [vmem:[%s6421_s14 + $0xf0] sm:$0xff] %vm267_vm0, %v3736_v56 }
 0x20f PF: > { %s14_s15 = sadd.s32 1, %s5417_s15  }
 0x210   : > { %p11_p4 = scmp.ge.s32.totalorder %s14_s15, 4  }
 0x212   :  { %13 = sbr.rel (!%p11_p4) target bundleno = 1 (0x1), region = 76 }

</bundles_post_ra>
